<compile_context>
chip_gen: v5e
topology: v5e:2x2
jax: 0.10.0
libtpu: 0.0.40
codegen_flags: <defaults>
</compile_context>

<pallas_src>
import jax
import jax.numpy as jnp
from jax import lax
from jax.experimental import pallas as pl
from jax.experimental.pallas import tpu as pltpu

NUM_ACT = 3          # [identity, square, x*0]
LANE = 128
CHUNK = 16           # sublane rows per inner chunk (1 bf16 vreg / 2 f32 vregs per slab)
TILE_ROWS = 512      # max sublane-rows (x128 lanes) per grid step; sweep 256-1024
MIN_GRID_STEPS = 4   # aim for >=4 grid steps so v7x's two TensorCores both get work


def _round_up(a: int, m: int) -> int:
    return ((a + m - 1) // m) * m


# --------------------------- fused Pallas kernel ----------------------------
def _make_fused_kernel(layer_sizes, compute_dtype):
    """Build the fused KharKAN kernel for a static tuple of layer sizes."""
    n_layers = len(layer_sizes) - 1
    n_in0 = layer_sizes[0]
    n_out_last = layer_sizes[-1]

    def kernel(params_ref, x_ref, o_ref):
        # params_ref : (P,) f32 SMEM (scalar prefetch).  Folded weights, layer-major
        #              blocks [W0 (n_out*n_in), b0 (n_out), W1 (n_out*n_in), b1 (n_out)].
        # x_ref      : (n_in0, tb, 128) compute_dtype VMEM -- batch on (sublane, lane).
        # o_ref      : (n_out_last, tb, 128) f32 VMEM.
        tb = x_ref.shape[1]
        n_chunks = tb // CHUNK

        # Hoist all scalar SMEM reads (and casts to the compute dtype) out of
        # the chunk loop -- one sld per scalar per grid step.
        lparams = []
        base = 0
        for l in range(n_layers):
            n_in, n_out = layer_sizes[l], layer_sizes[l + 1]
            w0_off = base                                   # W0[i, j] at w0_off + i*n_in + j
            b0_off = base + n_out * n_in                    # b0[i]
            w1_off = base + n_out * (n_in + 1)              # W1[i, j]
            b1_off = base + 2 * n_out * n_in + n_out        # b1[i]
            w0 = [[params_ref[w0_off + i * n_in + j].astype(compute_dtype)
                   for j in range(n_in)] for i in range(n_out)]
            b0 = [params_ref[b0_off + i].astype(compute_dtype) for i in range(n_out)]
            w1 = [[params_ref[w1_off + i * n_in + j].astype(compute_dtype)
                   for j in range(n_in)] for i in range(n_out)]
            b1 = [params_ref[b1_off + i].astype(compute_dtype) for i in range(n_out)]
            lparams.append((n_in, n_out, w0, b0, w1, b1))
            base += 2 * n_out * (n_in + 1)

        def chunk_body(c, carry):
            # Run the full 2->8->3->1 chain on one (CHUNK, 128) batch chunk so
            # every intermediate stays resident in vregs (no VMEM spill / vst
            # pressure), per the performance review.
            row = pl.multiple_of(c * CHUNK, CHUNK)
            acts = [x_ref[j, pl.ds(row, CHUNK), :] for j in range(n_in0)]
            for (n_in, n_out, w0, b0, w1, b1) in lparams:
                new_acts = []
                for i in range(n_out):
                    # VPU broadcast-MAC: scalar * (CHUNK,128) slab, fully unrolled.
                    y0 = w0[i][0] * acts[0]
                    y1 = w1[i][0] * acts[0]
                    for j in range(1, n_in):
                        y0 = y0 + w0[i][j] * acts[j]
                        y1 = y1 + w1[i][j] * acts[j]
                    y0 = y0 + b0[i]
                    y1 = y1 + b1[i]
                    # slot-2 activation is x*0 -> contributes exactly zero (dropped).
                    new_acts.append(y0 + y1 * y1)
                acts = new_acts
            for i in range(n_out_last):
                o_ref[i, pl.ds(row, CHUNK), :] = acts[i].astype(o_ref.dtype)
            return carry

        lax.fori_loop(0, n_chunks, chunk_body, 0)

    return kernel


# ------------------------- host-side parameter glue -------------------------
def _fold_params(params, normalize=True):
    """Fold normalized |conv| regression weights into the linear weights."""
    flat = []
    for (w_lin, b_lin, w_reg) in params:
        n_out = w_reg.shape[0]
        w_abs = jnp.abs(w_reg[:, 0, :]).astype(jnp.float32)           # (n_out, 3)
        if normalize:
            s = jnp.sum(w_abs, axis=1, keepdims=True)                 # denom still includes slot 2
            s = jnp.where(s > 0, s, jnp.ones_like(s))
            w_abs = w_abs / s
        n_in = w_lin.shape[1]
        W = w_lin.astype(jnp.float32).reshape(n_out, NUM_ACT, n_in)   # rows are (i, k) = i*3 + k
        Bv = b_lin.astype(jnp.float32).reshape(n_out, NUM_ACT)
        w0 = w_abs[:, 0:1] * W[:, 0, :]                               # identity slot: scale by wr0
        b0 = w_abs[:, 0] * Bv[:, 0]
        s1 = jnp.sqrt(w_abs[:, 1])                                    # wr1 >= 0 -> sqrt is valid
        w1 = s1[:, None] * W[:, 1, :]                                 # square slot: scale by sqrt(wr1)
        b1 = s1 * Bv[:, 1]
        flat += [w0.reshape(-1), b0, w1.reshape(-1), b1]
    return jnp.concatenate(flat)


def khar_kan_forward(x, params, normalize=True, tile_rows=TILE_ROWS,
                     compute_dtype=jnp.float32, x_feature_major=False):
    """Fused KharKAN forward.

    x: (B, n_in0)  [or (n_in0, B) if x_feature_major=True]  ->  (B, n_out_last).
    compute_dtype: jnp.float32 (default, exact) or jnp.bfloat16 (v6e/v7x fast path).
    """
    if x_feature_major:
        n_in0, B = x.shape
        x_fm = x
    else:
        B, n_in0 = x.shape
        # TODO(synk): have the upstream producer emit x feature-major (n_in0, B)
        # (or fuse this transpose into it) to drop the extra HBM read+write pass.
        x_fm = jnp.transpose(x)

    layer_sizes = (n_in0,) + tuple(int(w_reg.shape[0]) for (_, _, w_reg) in params)
    n_out_last = layer_sizes[-1]

    p_flat = _fold_params(params, normalize=normalize)    # stays f32 in SMEM

    # Batch tiling: lane-dense (nb rows of 128), tb rows per grid step.
    nb = max(1, pl.cdiv(B, LANE))
    tile_rows = max(CHUNK, _round_up(int(tile_rows), CHUNK))
    # Cap tb so the grid has ~MIN_GRID_STEPS steps when the batch allows it
    # (>=2 steps -> v7x's second TensorCore is used); always a multiple of CHUNK.
    tb_cap = _round_up(pl.cdiv(nb, MIN_GRID_STEPS), CHUNK)
    tb = max(CHUNK, min(tile_rows, tb_cap))
    nb_pad = _round_up(nb, tb)
    b_pad = nb_pad * LANE

    # (n_in0, B) -> (n_in0, nb_pad, 128): features on the (untiled) leading axis,
    # batch spread over sublanes x lanes -> lane-dense, unmasked loads/stores.
    xt = jnp.pad(x_fm.astype(compute_dtype), ((0, 0), (0, b_pad - B)))
    xt = xt.reshape(n_in0, nb_pad, LANE)

    kernel = _make_fused_kernel(layer_sizes, compute_dtype)
    out = pl.pallas_call(
        kernel,
        out_shape=jax.ShapeDtypeStruct((n_out_last, nb_pad, LANE), jnp.float32),
        grid_spec=pltpu.PrefetchScalarGridSpec(
            num_scalar_prefetch=1,                                    # folded params -> SMEM
            grid=(nb_pad // tb,),
            in_specs=[pl.BlockSpec((n_in0, tb, LANE), lambda i, p: (0, i, 0))],
            out_specs=pl.BlockSpec((n_out_last, tb, LANE), lambda i, p: (0, i, 0)),
        ),
        compiler_params=pltpu.CompilerParams(
            dimension_semantics=("parallel",)),   # v7x: shard batch grid across both TCs
    )(p_flat, xt)

    return jnp.transpose(out.reshape(n_out_last, b_pad)[:, :B])


# ---------------- pure-JAX reference (for correctness check only) -----------
def _ref_layer(x, w_lin, b_lin, w_reg, normalize=True):
    y = x @ w_lin.T + b_lin                                       # (B, N_out*3)
    n_out = w_reg.shape[0]
    y = y.reshape(-1, n_out, NUM_ACT)
    a0 = y[:, :, 0]
    a1 = jnp.square(y[:, :, 1])
    a2 = y[:, :, 2] * 0.0
    w = jnp.abs(w_reg[:, 0, :])
    if normalize:
        s = jnp.sum(w, axis=1, keepdims=True)
        s = jnp.where(s > 0, s, jnp.ones_like(s))
        w = w / s
    return a0 * w[None, :, 0] + a1 * w[None, :, 1] + a2 * w[None, :, 2]


def _ref_forward(x, params, normalize=True):
    for (w_lin, b_lin, w_reg) in params:
        x = _ref_layer(x, w_lin, b_lin, w_reg, normalize=normalize)
    return x


# ---------------- deterministic parameter init ------------------------------
def init_params(key, layers=(2, 8, 3, 1)):
    params = []
    for i in range(len(layers) - 1):
        n_in, n_out = layers[i], layers[i + 1]
        key, k1, k2, k3 = jax.random.split(key, 4)
        w_lin = jax.random.uniform(k1, (n_out * NUM_ACT, n_in), jnp.float32, -0.5, 0.5)
        b_lin = jax.random.uniform(k2, (n_out * NUM_ACT,), jnp.float32, -0.5, 0.5)
        w_reg = jax.random.uniform(k3, (n_out, 1, NUM_ACT), jnp.float32, -1.0, 1.0)
        params.append((w_lin, b_lin, w_reg))
    return params


if __name__ == "__main__":
    key = jax.random.PRNGKey(0)
    key, kx, kp = jax.random.split(key, 3)

    layers = (2, 8, 3, 1)          # KharKAN default architecture
    batch = 8
    x = jax.random.normal(kx, (batch, layers[0]), dtype=jnp.float32)
    params = init_params(kp, layers)

    fwd = jax.jit(khar_kan_forward,
                  static_argnames=("normalize", "tile_rows", "compute_dtype",
                                   "x_feature_major"))

    # Small batch: exercises padding-to-16-sublane-rows, single grid step.
    out = jax.block_until_ready(fwd(x, params))
    ref = _ref_forward(x, params)
    assert out.shape == (batch, layers[-1]), out.shape
    assert jnp.allclose(out, ref, atol=1e-5, rtol=1e-4), (out, ref)

    # Larger, non-multiple-of-128 batch: exercises padding, tb > CHUNK
    # (multi-chunk fori_loop) and a multi-step "parallel" grid (v7x: both TCs).
    key, kx2 = jax.random.split(key)
    x2 = jax.random.normal(kx2, (9000, layers[0]), dtype=jnp.float32)
    out2 = jax.block_until_ready(fwd(x2, params))
    ref2 = _ref_forward(x2, params)
    assert out2.shape == (9000, layers[-1]), out2.shape
    assert jnp.allclose(out2, ref2, atol=1e-5, rtol=1e-4)

    # Feature-major entry point: caller supplies x as (n_in0, B) and the
    # host-side transpose round trip is skipped entirely.
    out3 = jax.block_until_ready(
        fwd(jnp.transpose(x2), params, x_feature_major=True))
    assert jnp.allclose(out3, ref2, atol=1e-5, rtol=1e-4)

    # Optional bf16 compute path (perf-review item for v6e/v7x bf16 VPUs).
    # Guarded: it is a hardware-specific fast path, skipped silently if this
    # chip / toolchain does not handle the bf16 scalar-splat lowering (e.g. v5e).
    try:
        out_bf16 = jax.block_until_ready(
            fwd(x2, params, compute_dtype=jnp.bfloat16))
        assert out_bf16.shape == (9000, layers[-1])
        assert jnp.allclose(out_bf16, ref2, atol=5e-2, rtol=1e-1)
    except Exception:
        pass  # bf16 path is optional; f32 path above is the validated default.

    print("KERNEL_OK")
</pallas_src>

<mosaic_0001>
module attributes {stable_mosaic.version = 11 : i64} {
  func.func @kernel(%arg0: i32, %arg1: memref<110xf32, #tpu.memory_space<smem>>, %arg2: memref<2x16x128xf32, #tpu.memory_space<vmem>>, %arg3: memref<1x16x128xf32, #tpu.memory_space<vmem>>) attributes {dimension_semantics = [#tpu.dimension_semantics<parallel>], iteration_bounds = array<i64: 1>, scalar_prefetch = 1 : i64, scratch_operands = 0 : i64, tpu.core_type = #tpu.core_type<tc>, window_params = [{transform_indices = @transform_0, window_bounds = array<i64: 2, 16, 128>}, {transform_indices = @transform_1, window_bounds = array<i64: 1, 16, 128>}]} {
    %c0 = arith.constant 0 : index
    %0 = memref.load %arg1[%c0] : memref<110xf32, #tpu.memory_space<smem>>
    %c1 = arith.constant 1 : index
    %1 = memref.load %arg1[%c1] : memref<110xf32, #tpu.memory_space<smem>>
    %c2 = arith.constant 2 : index
    %2 = memref.load %arg1[%c2] : memref<110xf32, #tpu.memory_space<smem>>
    %c3 = arith.constant 3 : index
    %3 = memref.load %arg1[%c3] : memref<110xf32, #tpu.memory_space<smem>>
    %c4 = arith.constant 4 : index
    %4 = memref.load %arg1[%c4] : memref<110xf32, #tpu.memory_space<smem>>
    %c5 = arith.constant 5 : index
    %5 = memref.load %arg1[%c5] : memref<110xf32, #tpu.memory_space<smem>>
    %c6 = arith.constant 6 : index
    %6 = memref.load %arg1[%c6] : memref<110xf32, #tpu.memory_space<smem>>
    %c7 = arith.constant 7 : index
    %7 = memref.load %arg1[%c7] : memref<110xf32, #tpu.memory_space<smem>>
    %c8 = arith.constant 8 : index
    %8 = memref.load %arg1[%c8] : memref<110xf32, #tpu.memory_space<smem>>
    %c9 = arith.constant 9 : index
    %9 = memref.load %arg1[%c9] : memref<110xf32, #tpu.memory_space<smem>>
    %c10 = arith.constant 10 : index
    %10 = memref.load %arg1[%c10] : memref<110xf32, #tpu.memory_space<smem>>
    %c11 = arith.constant 11 : index
    %11 = memref.load %arg1[%c11] : memref<110xf32, #tpu.memory_space<smem>>
    %c12 = arith.constant 12 : index
    %12 = memref.load %arg1[%c12] : memref<110xf32, #tpu.memory_space<smem>>
    %c13 = arith.constant 13 : index
    %13 = memref.load %arg1[%c13] : memref<110xf32, #tpu.memory_space<smem>>
    %c14 = arith.constant 14 : index
    %14 = memref.load %arg1[%c14] : memref<110xf32, #tpu.memory_space<smem>>
    %c15 = arith.constant 15 : index
    %15 = memref.load %arg1[%c15] : memref<110xf32, #tpu.memory_space<smem>>
    %c16 = arith.constant 16 : index
    %16 = memref.load %arg1[%c16] : memref<110xf32, #tpu.memory_space<smem>>
    %c17 = arith.constant 17 : index
    %17 = memref.load %arg1[%c17] : memref<110xf32, #tpu.memory_space<smem>>
    %c18 = arith.constant 18 : index
    %18 = memref.load %arg1[%c18] : memref<110xf32, #tpu.memory_space<smem>>
    %c19 = arith.constant 19 : index
    %19 = memref.load %arg1[%c19] : memref<110xf32, #tpu.memory_space<smem>>
    %c20 = arith.constant 20 : index
    %20 = memref.load %arg1[%c20] : memref<110xf32, #tpu.memory_space<smem>>
    %c21 = arith.constant 21 : index
    %21 = memref.load %arg1[%c21] : memref<110xf32, #tpu.memory_space<smem>>
    %c22 = arith.constant 22 : index
    %22 = memref.load %arg1[%c22] : memref<110xf32, #tpu.memory_space<smem>>
    %c23 = arith.constant 23 : index
    %23 = memref.load %arg1[%c23] : memref<110xf32, #tpu.memory_space<smem>>
    %c24 = arith.constant 24 : index
    %24 = memref.load %arg1[%c24] : memref<110xf32, #tpu.memory_space<smem>>
    %c25 = arith.constant 25 : index
    %25 = memref.load %arg1[%c25] : memref<110xf32, #tpu.memory_space<smem>>
    %c26 = arith.constant 26 : index
    %26 = memref.load %arg1[%c26] : memref<110xf32, #tpu.memory_space<smem>>
    %c27 = arith.constant 27 : index
    %27 = memref.load %arg1[%c27] : memref<110xf32, #tpu.memory_space<smem>>
    %c28 = arith.constant 28 : index
    %28 = memref.load %arg1[%c28] : memref<110xf32, #tpu.memory_space<smem>>
    %c29 = arith.constant 29 : index
    %29 = memref.load %arg1[%c29] : memref<110xf32, #tpu.memory_space<smem>>
    %c30 = arith.constant 30 : index
    %30 = memref.load %arg1[%c30] : memref<110xf32, #tpu.memory_space<smem>>
    %c31 = arith.constant 31 : index
    %31 = memref.load %arg1[%c31] : memref<110xf32, #tpu.memory_space<smem>>
    %c32 = arith.constant 32 : index
    %32 = memref.load %arg1[%c32] : memref<110xf32, #tpu.memory_space<smem>>
    %c33 = arith.constant 33 : index
    %33 = memref.load %arg1[%c33] : memref<110xf32, #tpu.memory_space<smem>>
    %c34 = arith.constant 34 : index
    %34 = memref.load %arg1[%c34] : memref<110xf32, #tpu.memory_space<smem>>
    %c35 = arith.constant 35 : index
    %35 = memref.load %arg1[%c35] : memref<110xf32, #tpu.memory_space<smem>>
    %c36 = arith.constant 36 : index
    %36 = memref.load %arg1[%c36] : memref<110xf32, #tpu.memory_space<smem>>
    %c37 = arith.constant 37 : index
    %37 = memref.load %arg1[%c37] : memref<110xf32, #tpu.memory_space<smem>>
    %c38 = arith.constant 38 : index
    %38 = memref.load %arg1[%c38] : memref<110xf32, #tpu.memory_space<smem>>
    %c39 = arith.constant 39 : index
    %39 = memref.load %arg1[%c39] : memref<110xf32, #tpu.memory_space<smem>>
    %c40 = arith.constant 40 : index
    %40 = memref.load %arg1[%c40] : memref<110xf32, #tpu.memory_space<smem>>
    %c41 = arith.constant 41 : index
    %41 = memref.load %arg1[%c41] : memref<110xf32, #tpu.memory_space<smem>>
    %c42 = arith.constant 42 : index
    %42 = memref.load %arg1[%c42] : memref<110xf32, #tpu.memory_space<smem>>
    %c43 = arith.constant 43 : index
    %43 = memref.load %arg1[%c43] : memref<110xf32, #tpu.memory_space<smem>>
    %c44 = arith.constant 44 : index
    %44 = memref.load %arg1[%c44] : memref<110xf32, #tpu.memory_space<smem>>
    %c45 = arith.constant 45 : index
    %45 = memref.load %arg1[%c45] : memref<110xf32, #tpu.memory_space<smem>>
    %c46 = arith.constant 46 : index
    %46 = memref.load %arg1[%c46] : memref<110xf32, #tpu.memory_space<smem>>
    %c47 = arith.constant 47 : index
    %47 = memref.load %arg1[%c47] : memref<110xf32, #tpu.memory_space<smem>>
    %c48 = arith.constant 48 : index
    %48 = memref.load %arg1[%c48] : memref<110xf32, #tpu.memory_space<smem>>
    %c49 = arith.constant 49 : index
    %49 = memref.load %arg1[%c49] : memref<110xf32, #tpu.memory_space<smem>>
    %c50 = arith.constant 50 : index
    %50 = memref.load %arg1[%c50] : memref<110xf32, #tpu.memory_space<smem>>
    %c51 = arith.constant 51 : index
    %51 = memref.load %arg1[%c51] : memref<110xf32, #tpu.memory_space<smem>>
    %c52 = arith.constant 52 : index
    %52 = memref.load %arg1[%c52] : memref<110xf32, #tpu.memory_space<smem>>
    %c53 = arith.constant 53 : index
    %53 = memref.load %arg1[%c53] : memref<110xf32, #tpu.memory_space<smem>>
    %c54 = arith.constant 54 : index
    %54 = memref.load %arg1[%c54] : memref<110xf32, #tpu.memory_space<smem>>
    %c55 = arith.constant 55 : index
    %55 = memref.load %arg1[%c55] : memref<110xf32, #tpu.memory_space<smem>>
    %c56 = arith.constant 56 : index
    %56 = memref.load %arg1[%c56] : memref<110xf32, #tpu.memory_space<smem>>
    %c57 = arith.constant 57 : index
    %57 = memref.load %arg1[%c57] : memref<110xf32, #tpu.memory_space<smem>>
    %c58 = arith.constant 58 : index
    %58 = memref.load %arg1[%c58] : memref<110xf32, #tpu.memory_space<smem>>
    %c59 = arith.constant 59 : index
    %59 = memref.load %arg1[%c59] : memref<110xf32, #tpu.memory_space<smem>>
    %c60 = arith.constant 60 : index
    %60 = memref.load %arg1[%c60] : memref<110xf32, #tpu.memory_space<smem>>
    %c61 = arith.constant 61 : index
    %61 = memref.load %arg1[%c61] : memref<110xf32, #tpu.memory_space<smem>>
    %c62 = arith.constant 62 : index
    %62 = memref.load %arg1[%c62] : memref<110xf32, #tpu.memory_space<smem>>
    %c63 = arith.constant 63 : index
    %63 = memref.load %arg1[%c63] : memref<110xf32, #tpu.memory_space<smem>>
    %c64 = arith.constant 64 : index
    %64 = memref.load %arg1[%c64] : memref<110xf32, #tpu.memory_space<smem>>
    %c65 = arith.constant 65 : index
    %65 = memref.load %arg1[%c65] : memref<110xf32, #tpu.memory_space<smem>>
    %c66 = arith.constant 66 : index
    %66 = memref.load %arg1[%c66] : memref<110xf32, #tpu.memory_space<smem>>
    %c67 = arith.constant 67 : index
    %67 = memref.load %arg1[%c67] : memref<110xf32, #tpu.memory_space<smem>>
    %c68 = arith.constant 68 : index
    %68 = memref.load %arg1[%c68] : memref<110xf32, #tpu.memory_space<smem>>
    %c69 = arith.constant 69 : index
    %69 = memref.load %arg1[%c69] : memref<110xf32, #tpu.memory_space<smem>>
    %c70 = arith.constant 70 : index
    %70 = memref.load %arg1[%c70] : memref<110xf32, #tpu.memory_space<smem>>
    %c71 = arith.constant 71 : index
    %71 = memref.load %arg1[%c71] : memref<110xf32, #tpu.memory_space<smem>>
    %c72 = arith.constant 72 : index
    %72 = memref.load %arg1[%c72] : memref<110xf32, #tpu.memory_space<smem>>
    %c73 = arith.constant 73 : index
    %73 = memref.load %arg1[%c73] : memref<110xf32, #tpu.memory_space<smem>>
    %c74 = arith.constant 74 : index
    %74 = memref.load %arg1[%c74] : memref<110xf32, #tpu.memory_space<smem>>
    %c75 = arith.constant 75 : index
    %75 = memref.load %arg1[%c75] : memref<110xf32, #tpu.memory_space<smem>>
    %c76 = arith.constant 76 : index
    %76 = memref.load %arg1[%c76] : memref<110xf32, #tpu.memory_space<smem>>
    %c77 = arith.constant 77 : index
    %77 = memref.load %arg1[%c77] : memref<110xf32, #tpu.memory_space<smem>>
    %c78 = arith.constant 78 : index
    %78 = memref.load %arg1[%c78] : memref<110xf32, #tpu.memory_space<smem>>
    %c79 = arith.constant 79 : index
    %79 = memref.load %arg1[%c79] : memref<110xf32, #tpu.memory_space<smem>>
    %c80 = arith.constant 80 : index
    %80 = memref.load %arg1[%c80] : memref<110xf32, #tpu.memory_space<smem>>
    %c81 = arith.constant 81 : index
    %81 = memref.load %arg1[%c81] : memref<110xf32, #tpu.memory_space<smem>>
    %c82 = arith.constant 82 : index
    %82 = memref.load %arg1[%c82] : memref<110xf32, #tpu.memory_space<smem>>
    %c83 = arith.constant 83 : index
    %83 = memref.load %arg1[%c83] : memref<110xf32, #tpu.memory_space<smem>>
    %c84 = arith.constant 84 : index
    %84 = memref.load %arg1[%c84] : memref<110xf32, #tpu.memory_space<smem>>
    %c85 = arith.constant 85 : index
    %85 = memref.load %arg1[%c85] : memref<110xf32, #tpu.memory_space<smem>>
    %c86 = arith.constant 86 : index
    %86 = memref.load %arg1[%c86] : memref<110xf32, #tpu.memory_space<smem>>
    %c87 = arith.constant 87 : index
    %87 = memref.load %arg1[%c87] : memref<110xf32, #tpu.memory_space<smem>>
    %c88 = arith.constant 88 : index
    %88 = memref.load %arg1[%c88] : memref<110xf32, #tpu.memory_space<smem>>
    %c89 = arith.constant 89 : index
    %89 = memref.load %arg1[%c89] : memref<110xf32, #tpu.memory_space<smem>>
    %c90 = arith.constant 90 : index
    %90 = memref.load %arg1[%c90] : memref<110xf32, #tpu.memory_space<smem>>
    %c91 = arith.constant 91 : index
    %91 = memref.load %arg1[%c91] : memref<110xf32, #tpu.memory_space<smem>>
    %c92 = arith.constant 92 : index
    %92 = memref.load %arg1[%c92] : memref<110xf32, #tpu.memory_space<smem>>
    %c93 = arith.constant 93 : index
    %93 = memref.load %arg1[%c93] : memref<110xf32, #tpu.memory_space<smem>>
    %c94 = arith.constant 94 : index
    %94 = memref.load %arg1[%c94] : memref<110xf32, #tpu.memory_space<smem>>
    %c95 = arith.constant 95 : index
    %95 = memref.load %arg1[%c95] : memref<110xf32, #tpu.memory_space<smem>>
    %c96 = arith.constant 96 : index
    %96 = memref.load %arg1[%c96] : memref<110xf32, #tpu.memory_space<smem>>
    %c97 = arith.constant 97 : index
    %97 = memref.load %arg1[%c97] : memref<110xf32, #tpu.memory_space<smem>>
    %c98 = arith.constant 98 : index
    %98 = memref.load %arg1[%c98] : memref<110xf32, #tpu.memory_space<smem>>
    %c99 = arith.constant 99 : index
    %99 = memref.load %arg1[%c99] : memref<110xf32, #tpu.memory_space<smem>>
    %c100 = arith.constant 100 : index
    %100 = memref.load %arg1[%c100] : memref<110xf32, #tpu.memory_space<smem>>
    %c101 = arith.constant 101 : index
    %101 = memref.load %arg1[%c101] : memref<110xf32, #tpu.memory_space<smem>>
    %c102 = arith.constant 102 : index
    %102 = memref.load %arg1[%c102] : memref<110xf32, #tpu.memory_space<smem>>
    %c103 = arith.constant 103 : index
    %103 = memref.load %arg1[%c103] : memref<110xf32, #tpu.memory_space<smem>>
    %c104 = arith.constant 104 : index
    %104 = memref.load %arg1[%c104] : memref<110xf32, #tpu.memory_space<smem>>
    %c105 = arith.constant 105 : index
    %105 = memref.load %arg1[%c105] : memref<110xf32, #tpu.memory_space<smem>>
    %c106 = arith.constant 106 : index
    %106 = memref.load %arg1[%c106] : memref<110xf32, #tpu.memory_space<smem>>
    %c107 = arith.constant 107 : index
    %107 = memref.load %arg1[%c107] : memref<110xf32, #tpu.memory_space<smem>>
    %c108 = arith.constant 108 : index
    %108 = memref.load %arg1[%c108] : memref<110xf32, #tpu.memory_space<smem>>
    %c109 = arith.constant 109 : index
    %109 = memref.load %arg1[%c109] : memref<110xf32, #tpu.memory_space<smem>>
    %c0_i32 = arith.constant 0 : i32
    %c16_i32 = arith.constant 16 : i32
    %110 = arith.muli %c0_i32, %c16_i32 : i32
    %111 = tpu.assume_multiple %110, 16 : i32
    %c0_0 = arith.constant 0 : index
    %112 = arith.index_cast %111 : i32 to index
    %c0_1 = arith.constant 0 : index
    %113 = vector.load %arg2[%c0_0, %112, %c0_1] : memref<2x16x128xf32, #tpu.memory_space<vmem>>, vector<1x16x128xf32>
    %114 = vector.shape_cast %113 : vector<1x16x128xf32> to vector<16x128xf32>
    %c1_2 = arith.constant 1 : index
    %115 = arith.index_cast %111 : i32 to index
    %c0_3 = arith.constant 0 : index
    %116 = vector.load %arg2[%c1_2, %115, %c0_3] : memref<2x16x128xf32, #tpu.memory_space<vmem>>, vector<1x16x128xf32>
    %117 = vector.shape_cast %116 : vector<1x16x128xf32> to vector<16x128xf32>
    %118 = vector.broadcast %0 : f32 to vector<16x128xf32>
    %119 = arith.mulf %118, %114 : vector<16x128xf32>
    %120 = vector.broadcast %24 : f32 to vector<16x128xf32>
    %121 = arith.mulf %120, %114 : vector<16x128xf32>
    %122 = vector.broadcast %1 : f32 to vector<16x128xf32>
    %123 = arith.mulf %122, %117 : vector<16x128xf32>
    %124 = arith.addf %119, %123 : vector<16x128xf32>
    %125 = vector.broadcast %25 : f32 to vector<16x128xf32>
    %126 = arith.mulf %125, %117 : vector<16x128xf32>
    %127 = arith.addf %121, %126 : vector<16x128xf32>
    %128 = vector.broadcast %16 : f32 to vector<16x128xf32>
    %129 = arith.addf %124, %128 : vector<16x128xf32>
    %130 = vector.broadcast %40 : f32 to vector<16x128xf32>
    %131 = arith.addf %127, %130 : vector<16x128xf32>
    %132 = arith.mulf %131, %131 : vector<16x128xf32>
    %133 = arith.addf %129, %132 : vector<16x128xf32>
    %134 = vector.broadcast %2 : f32 to vector<16x128xf32>
    %135 = arith.mulf %134, %114 : vector<16x128xf32>
    %136 = vector.broadcast %26 : f32 to vector<16x128xf32>
    %137 = arith.mulf %136, %114 : vector<16x128xf32>
    %138 = vector.broadcast %3 : f32 to vector<16x128xf32>
    %139 = arith.mulf %138, %117 : vector<16x128xf32>
    %140 = arith.addf %135, %139 : vector<16x128xf32>
    %141 = vector.broadcast %27 : f32 to vector<16x128xf32>
    %142 = arith.mulf %141, %117 : vector<16x128xf32>
    %143 = arith.addf %137, %142 : vector<16x128xf32>
    %144 = vector.broadcast %17 : f32 to vector<16x128xf32>
    %145 = arith.addf %140, %144 : vector<16x128xf32>
    %146 = vector.broadcast %41 : f32 to vector<16x128xf32>
    %147 = arith.addf %143, %146 : vector<16x128xf32>
    %148 = arith.mulf %147, %147 : vector<16x128xf32>
    %149 = arith.addf %145, %148 : vector<16x128xf32>
    %150 = vector.broadcast %4 : f32 to vector<16x128xf32>
    %151 = arith.mulf %150, %114 : vector<16x128xf32>
    %152 = vector.broadcast %28 : f32 to vector<16x128xf32>
    %153 = arith.mulf %152, %114 : vector<16x128xf32>
    %154 = vector.broadcast %5 : f32 to vector<16x128xf32>
    %155 = arith.mulf %154, %117 : vector<16x128xf32>
    %156 = arith.addf %151, %155 : vector<16x128xf32>
    %157 = vector.broadcast %29 : f32 to vector<16x128xf32>
    %158 = arith.mulf %157, %117 : vector<16x128xf32>
    %159 = arith.addf %153, %158 : vector<16x128xf32>
    %160 = vector.broadcast %18 : f32 to vector<16x128xf32>
    %161 = arith.addf %156, %160 : vector<16x128xf32>
    %162 = vector.broadcast %42 : f32 to vector<16x128xf32>
    %163 = arith.addf %159, %162 : vector<16x128xf32>
    %164 = arith.mulf %163, %163 : vector<16x128xf32>
    %165 = arith.addf %161, %164 : vector<16x128xf32>
    %166 = vector.broadcast %6 : f32 to vector<16x128xf32>
    %167 = arith.mulf %166, %114 : vector<16x128xf32>
    %168 = vector.broadcast %30 : f32 to vector<16x128xf32>
    %169 = arith.mulf %168, %114 : vector<16x128xf32>
    %170 = vector.broadcast %7 : f32 to vector<16x128xf32>
    %171 = arith.mulf %170, %117 : vector<16x128xf32>
    %172 = arith.addf %167, %171 : vector<16x128xf32>
    %173 = vector.broadcast %31 : f32 to vector<16x128xf32>
    %174 = arith.mulf %173, %117 : vector<16x128xf32>
    %175 = arith.addf %169, %174 : vector<16x128xf32>
    %176 = vector.broadcast %19 : f32 to vector<16x128xf32>
    %177 = arith.addf %172, %176 : vector<16x128xf32>
    %178 = vector.broadcast %43 : f32 to vector<16x128xf32>
    %179 = arith.addf %175, %178 : vector<16x128xf32>
    %180 = arith.mulf %179, %179 : vector<16x128xf32>
    %181 = arith.addf %177, %180 : vector<16x128xf32>
    %182 = vector.broadcast %8 : f32 to vector<16x128xf32>
    %183 = arith.mulf %182, %114 : vector<16x128xf32>
    %184 = vector.broadcast %32 : f32 to vector<16x128xf32>
    %185 = arith.mulf %184, %114 : vector<16x128xf32>
    %186 = vector.broadcast %9 : f32 to vector<16x128xf32>
    %187 = arith.mulf %186, %117 : vector<16x128xf32>
    %188 = arith.addf %183, %187 : vector<16x128xf32>
    %189 = vector.broadcast %33 : f32 to vector<16x128xf32>
    %190 = arith.mulf %189, %117 : vector<16x128xf32>
    %191 = arith.addf %185, %190 : vector<16x128xf32>
    %192 = vector.broadcast %20 : f32 to vector<16x128xf32>
    %193 = arith.addf %188, %192 : vector<16x128xf32>
    %194 = vector.broadcast %44 : f32 to vector<16x128xf32>
    %195 = arith.addf %191, %194 : vector<16x128xf32>
    %196 = arith.mulf %195, %195 : vector<16x128xf32>
    %197 = arith.addf %193, %196 : vector<16x128xf32>
    %198 = vector.broadcast %10 : f32 to vector<16x128xf32>
    %199 = arith.mulf %198, %114 : vector<16x128xf32>
    %200 = vector.broadcast %34 : f32 to vector<16x128xf32>
    %201 = arith.mulf %200, %114 : vector<16x128xf32>
    %202 = vector.broadcast %11 : f32 to vector<16x128xf32>
    %203 = arith.mulf %202, %117 : vector<16x128xf32>
    %204 = arith.addf %199, %203 : vector<16x128xf32>
    %205 = vector.broadcast %35 : f32 to vector<16x128xf32>
    %206 = arith.mulf %205, %117 : vector<16x128xf32>
    %207 = arith.addf %201, %206 : vector<16x128xf32>
    %208 = vector.broadcast %21 : f32 to vector<16x128xf32>
    %209 = arith.addf %204, %208 : vector<16x128xf32>
    %210 = vector.broadcast %45 : f32 to vector<16x128xf32>
    %211 = arith.addf %207, %210 : vector<16x128xf32>
    %212 = arith.mulf %211, %211 : vector<16x128xf32>
    %213 = arith.addf %209, %212 : vector<16x128xf32>
    %214 = vector.broadcast %12 : f32 to vector<16x128xf32>
    %215 = arith.mulf %214, %114 : vector<16x128xf32>
    %216 = vector.broadcast %36 : f32 to vector<16x128xf32>
    %217 = arith.mulf %216, %114 : vector<16x128xf32>
    %218 = vector.broadcast %13 : f32 to vector<16x128xf32>
    %219 = arith.mulf %218, %117 : vector<16x128xf32>
    %220 = arith.addf %215, %219 : vector<16x128xf32>
    %221 = vector.broadcast %37 : f32 to vector<16x128xf32>
    %222 = arith.mulf %221, %117 : vector<16x128xf32>
    %223 = arith.addf %217, %222 : vector<16x128xf32>
    %224 = vector.broadcast %22 : f32 to vector<16x128xf32>
    %225 = arith.addf %220, %224 : vector<16x128xf32>
    %226 = vector.broadcast %46 : f32 to vector<16x128xf32>
    %227 = arith.addf %223, %226 : vector<16x128xf32>
    %228 = arith.mulf %227, %227 : vector<16x128xf32>
    %229 = arith.addf %225, %228 : vector<16x128xf32>
    %230 = vector.broadcast %14 : f32 to vector<16x128xf32>
    %231 = arith.mulf %230, %114 : vector<16x128xf32>
    %232 = vector.broadcast %38 : f32 to vector<16x128xf32>
    %233 = arith.mulf %232, %114 : vector<16x128xf32>
    %234 = vector.broadcast %15 : f32 to vector<16x128xf32>
    %235 = arith.mulf %234, %117 : vector<16x128xf32>
    %236 = arith.addf %231, %235 : vector<16x128xf32>
    %237 = vector.broadcast %39 : f32 to vector<16x128xf32>
    %238 = arith.mulf %237, %117 : vector<16x128xf32>
    %239 = arith.addf %233, %238 : vector<16x128xf32>
    %240 = vector.broadcast %23 : f32 to vector<16x128xf32>
    %241 = arith.addf %236, %240 : vector<16x128xf32>
    %242 = vector.broadcast %47 : f32 to vector<16x128xf32>
    %243 = arith.addf %239, %242 : vector<16x128xf32>
    %244 = arith.mulf %243, %243 : vector<16x128xf32>
    %245 = arith.addf %241, %244 : vector<16x128xf32>
    %246 = vector.broadcast %48 : f32 to vector<16x128xf32>
    %247 = arith.mulf %246, %133 : vector<16x128xf32>
    %248 = vector.broadcast %75 : f32 to vector<16x128xf32>
    %249 = arith.mulf %248, %133 : vector<16x128xf32>
    %250 = vector.broadcast %49 : f32 to vector<16x128xf32>
    %251 = arith.mulf %250, %149 : vector<16x128xf32>
    %252 = arith.addf %247, %251 : vector<16x128xf32>
    %253 = vector.broadcast %76 : f32 to vector<16x128xf32>
    %254 = arith.mulf %253, %149 : vector<16x128xf32>
    %255 = arith.addf %249, %254 : vector<16x128xf32>
    %256 = vector.broadcast %50 : f32 to vector<16x128xf32>
    %257 = arith.mulf %256, %165 : vector<16x128xf32>
    %258 = arith.addf %252, %257 : vector<16x128xf32>
    %259 = vector.broadcast %77 : f32 to vector<16x128xf32>
    %260 = arith.mulf %259, %165 : vector<16x128xf32>
    %261 = arith.addf %255, %260 : vector<16x128xf32>
    %262 = vector.broadcast %51 : f32 to vector<16x128xf32>
    %263 = arith.mulf %262, %181 : vector<16x128xf32>
    %264 = arith.addf %258, %263 : vector<16x128xf32>
    %265 = vector.broadcast %78 : f32 to vector<16x128xf32>
    %266 = arith.mulf %265, %181 : vector<16x128xf32>
    %267 = arith.addf %261, %266 : vector<16x128xf32>
    %268 = vector.broadcast %52 : f32 to vector<16x128xf32>
    %269 = arith.mulf %268, %197 : vector<16x128xf32>
    %270 = arith.addf %264, %269 : vector<16x128xf32>
    %271 = vector.broadcast %79 : f32 to vector<16x128xf32>
    %272 = arith.mulf %271, %197 : vector<16x128xf32>
    %273 = arith.addf %267, %272 : vector<16x128xf32>
    %274 = vector.broadcast %53 : f32 to vector<16x128xf32>
    %275 = arith.mulf %274, %213 : vector<16x128xf32>
    %276 = arith.addf %270, %275 : vector<16x128xf32>
    %277 = vector.broadcast %80 : f32 to vector<16x128xf32>
    %278 = arith.mulf %277, %213 : vector<16x128xf32>
    %279 = arith.addf %273, %278 : vector<16x128xf32>
    %280 = vector.broadcast %54 : f32 to vector<16x128xf32>
    %281 = arith.mulf %280, %229 : vector<16x128xf32>
    %282 = arith.addf %276, %281 : vector<16x128xf32>
    %283 = vector.broadcast %81 : f32 to vector<16x128xf32>
    %284 = arith.mulf %283, %229 : vector<16x128xf32>
    %285 = arith.addf %279, %284 : vector<16x128xf32>
    %286 = vector.broadcast %55 : f32 to vector<16x128xf32>
    %287 = arith.mulf %286, %245 : vector<16x128xf32>
    %288 = arith.addf %282, %287 : vector<16x128xf32>
    %289 = vector.broadcast %82 : f32 to vector<16x128xf32>
    %290 = arith.mulf %289, %245 : vector<16x128xf32>
    %291 = arith.addf %285, %290 : vector<16x128xf32>
    %292 = vector.broadcast %72 : f32 to vector<16x128xf32>
    %293 = arith.addf %288, %292 : vector<16x128xf32>
    %294 = vector.broadcast %99 : f32 to vector<16x128xf32>
    %295 = arith.addf %291, %294 : vector<16x128xf32>
    %296 = arith.mulf %295, %295 : vector<16x128xf32>
    %297 = arith.addf %293, %296 : vector<16x128xf32>
    %298 = vector.broadcast %56 : f32 to vector<16x128xf32>
    %299 = arith.mulf %298, %133 : vector<16x128xf32>
    %300 = vector.broadcast %83 : f32 to vector<16x128xf32>
    %301 = arith.mulf %300, %133 : vector<16x128xf32>
    %302 = vector.broadcast %57 : f32 to vector<16x128xf32>
    %303 = arith.mulf %302, %149 : vector<16x128xf32>
    %304 = arith.addf %299, %303 : vector<16x128xf32>
    %305 = vector.broadcast %84 : f32 to vector<16x128xf32>
    %306 = arith.mulf %305, %149 : vector<16x128xf32>
    %307 = arith.addf %301, %306 : vector<16x128xf32>
    %308 = vector.broadcast %58 : f32 to vector<16x128xf32>
    %309 = arith.mulf %308, %165 : vector<16x128xf32>
    %310 = arith.addf %304, %309 : vector<16x128xf32>
    %311 = vector.broadcast %85 : f32 to vector<16x128xf32>
    %312 = arith.mulf %311, %165 : vector<16x128xf32>
    %313 = arith.addf %307, %312 : vector<16x128xf32>
    %314 = vector.broadcast %59 : f32 to vector<16x128xf32>
    %315 = arith.mulf %314, %181 : vector<16x128xf32>
    %316 = arith.addf %310, %315 : vector<16x128xf32>
    %317 = vector.broadcast %86 : f32 to vector<16x128xf32>
    %318 = arith.mulf %317, %181 : vector<16x128xf32>
    %319 = arith.addf %313, %318 : vector<16x128xf32>
    %320 = vector.broadcast %60 : f32 to vector<16x128xf32>
    %321 = arith.mulf %320, %197 : vector<16x128xf32>
    %322 = arith.addf %316, %321 : vector<16x128xf32>
    %323 = vector.broadcast %87 : f32 to vector<16x128xf32>
    %324 = arith.mulf %323, %197 : vector<16x128xf32>
    %325 = arith.addf %319, %324 : vector<16x128xf32>
    %326 = vector.broadcast %61 : f32 to vector<16x128xf32>
    %327 = arith.mulf %326, %213 : vector<16x128xf32>
    %328 = arith.addf %322, %327 : vector<16x128xf32>
    %329 = vector.broadcast %88 : f32 to vector<16x128xf32>
    %330 = arith.mulf %329, %213 : vector<16x128xf32>
    %331 = arith.addf %325, %330 : vector<16x128xf32>
    %332 = vector.broadcast %62 : f32 to vector<16x128xf32>
    %333 = arith.mulf %332, %229 : vector<16x128xf32>
    %334 = arith.addf %328, %333 : vector<16x128xf32>
    %335 = vector.broadcast %89 : f32 to vector<16x128xf32>
    %336 = arith.mulf %335, %229 : vector<16x128xf32>
    %337 = arith.addf %331, %336 : vector<16x128xf32>
    %338 = vector.broadcast %63 : f32 to vector<16x128xf32>
    %339 = arith.mulf %338, %245 : vector<16x128xf32>
    %340 = arith.addf %334, %339 : vector<16x128xf32>
    %341 = vector.broadcast %90 : f32 to vector<16x128xf32>
    %342 = arith.mulf %341, %245 : vector<16x128xf32>
    %343 = arith.addf %337, %342 : vector<16x128xf32>
    %344 = vector.broadcast %73 : f32 to vector<16x128xf32>
    %345 = arith.addf %340, %344 : vector<16x128xf32>
    %346 = vector.broadcast %100 : f32 to vector<16x128xf32>
    %347 = arith.addf %343, %346 : vector<16x128xf32>
    %348 = arith.mulf %347, %347 : vector<16x128xf32>
    %349 = arith.addf %345, %348 : vector<16x128xf32>
    %350 = vector.broadcast %64 : f32 to vector<16x128xf32>
    %351 = arith.mulf %350, %133 : vector<16x128xf32>
    %352 = vector.broadcast %91 : f32 to vector<16x128xf32>
    %353 = arith.mulf %352, %133 : vector<16x128xf32>
    %354 = vector.broadcast %65 : f32 to vector<16x128xf32>
    %355 = arith.mulf %354, %149 : vector<16x128xf32>
    %356 = arith.addf %351, %355 : vector<16x128xf32>
    %357 = vector.broadcast %92 : f32 to vector<16x128xf32>
    %358 = arith.mulf %357, %149 : vector<16x128xf32>
    %359 = arith.addf %353, %358 : vector<16x128xf32>
    %360 = vector.broadcast %66 : f32 to vector<16x128xf32>
    %361 = arith.mulf %360, %165 : vector<16x128xf32>
    %362 = arith.addf %356, %361 : vector<16x128xf32>
    %363 = vector.broadcast %93 : f32 to vector<16x128xf32>
    %364 = arith.mulf %363, %165 : vector<16x128xf32>
    %365 = arith.addf %359, %364 : vector<16x128xf32>
    %366 = vector.broadcast %67 : f32 to vector<16x128xf32>
    %367 = arith.mulf %366, %181 : vector<16x128xf32>
    %368 = arith.addf %362, %367 : vector<16x128xf32>
    %369 = vector.broadcast %94 : f32 to vector<16x128xf32>
    %370 = arith.mulf %369, %181 : vector<16x128xf32>
    %371 = arith.addf %365, %370 : vector<16x128xf32>
    %372 = vector.broadcast %68 : f32 to vector<16x128xf32>
    %373 = arith.mulf %372, %197 : vector<16x128xf32>
    %374 = arith.addf %368, %373 : vector<16x128xf32>
    %375 = vector.broadcast %95 : f32 to vector<16x128xf32>
    %376 = arith.mulf %375, %197 : vector<16x128xf32>
    %377 = arith.addf %371, %376 : vector<16x128xf32>
    %378 = vector.broadcast %69 : f32 to vector<16x128xf32>
    %379 = arith.mulf %378, %213 : vector<16x128xf32>
    %380 = arith.addf %374, %379 : vector<16x128xf32>
    %381 = vector.broadcast %96 : f32 to vector<16x128xf32>
    %382 = arith.mulf %381, %213 : vector<16x128xf32>
    %383 = arith.addf %377, %382 : vector<16x128xf32>
    %384 = vector.broadcast %70 : f32 to vector<16x128xf32>
    %385 = arith.mulf %384, %229 : vector<16x128xf32>
    %386 = arith.addf %380, %385 : vector<16x128xf32>
    %387 = vector.broadcast %97 : f32 to vector<16x128xf32>
    %388 = arith.mulf %387, %229 : vector<16x128xf32>
    %389 = arith.addf %383, %388 : vector<16x128xf32>
    %390 = vector.broadcast %71 : f32 to vector<16x128xf32>
    %391 = arith.mulf %390, %245 : vector<16x128xf32>
    %392 = arith.addf %386, %391 : vector<16x128xf32>
    %393 = vector.broadcast %98 : f32 to vector<16x128xf32>
    %394 = arith.mulf %393, %245 : vector<16x128xf32>
    %395 = arith.addf %389, %394 : vector<16x128xf32>
    %396 = vector.broadcast %74 : f32 to vector<16x128xf32>
    %397 = arith.addf %392, %396 : vector<16x128xf32>
    %398 = vector.broadcast %101 : f32 to vector<16x128xf32>
    %399 = arith.addf %395, %398 : vector<16x128xf32>
    %400 = arith.mulf %399, %399 : vector<16x128xf32>
    %401 = arith.addf %397, %400 : vector<16x128xf32>
    %402 = vector.broadcast %102 : f32 to vector<16x128xf32>
    %403 = arith.mulf %402, %297 : vector<16x128xf32>
    %404 = vector.broadcast %106 : f32 to vector<16x128xf32>
    %405 = arith.mulf %404, %297 : vector<16x128xf32>
    %406 = vector.broadcast %103 : f32 to vector<16x128xf32>
    %407 = arith.mulf %406, %349 : vector<16x128xf32>
    %408 = arith.addf %403, %407 : vector<16x128xf32>
    %409 = vector.broadcast %107 : f32 to vector<16x128xf32>
    %410 = arith.mulf %409, %349 : vector<16x128xf32>
    %411 = arith.addf %405, %410 : vector<16x128xf32>
    %412 = vector.broadcast %104 : f32 to vector<16x128xf32>
    %413 = arith.mulf %412, %401 : vector<16x128xf32>
    %414 = arith.addf %408, %413 : vector<16x128xf32>
    %415 = vector.broadcast %108 : f32 to vector<16x128xf32>
    %416 = arith.mulf %415, %401 : vector<16x128xf32>
    %417 = arith.addf %411, %416 : vector<16x128xf32>
    %418 = vector.broadcast %105 : f32 to vector<16x128xf32>
    %419 = arith.addf %414, %418 : vector<16x128xf32>
    %420 = vector.broadcast %109 : f32 to vector<16x128xf32>
    %421 = arith.addf %417, %420 : vector<16x128xf32>
    %422 = arith.mulf %421, %421 : vector<16x128xf32>
    %423 = arith.addf %419, %422 : vector<16x128xf32>
    %c0_4 = arith.constant 0 : index
    %424 = arith.index_cast %111 : i32 to index
    %c0_5 = arith.constant 0 : index
    %425 = vector.load %arg3[%c0_4, %424, %c0_5] : memref<1x16x128xf32, #tpu.memory_space<vmem>>, vector<1x16x128xf32>
    %426 = vector.shape_cast %425 : vector<1x16x128xf32> to vector<16x128xf32>
    %427 = vector.shape_cast %423 : vector<16x128xf32> to vector<1x16x128xf32>
    tpu.vector_store %arg3[%c0_4, %424, %c0_5], %427 {strides = array<i32>} : memref<1x16x128xf32, #tpu.memory_space<vmem>>, vector<1x16x128xf32>,
    %c1_i32 = arith.constant 1 : i32
    return
  }
  func.func @transform_0(%arg0: i32, %arg1: memref<110xf32, #tpu.memory_space<smem>>) -> (i32, i32, i32) {
    %c0_i32 = arith.constant 0 : i32
    %c0_i32_0 = arith.constant 0 : i32
    %c0_i32_1 = arith.constant 0 : i32
    return %c0_i32, %arg0, %c0_i32_0 : i32, i32, i32
  }
  func.func @transform_1(%arg0: i32, %arg1: memref<110xf32, #tpu.memory_space<smem>>) -> (i32, i32, i32) {
    %c0_i32 = arith.constant 0 : i32
    %c0_i32_0 = arith.constant 0 : i32
    %c0_i32_1 = arith.constant 0 : i32
    return %c0_i32, %arg0, %c0_i32_0 : i32, i32, i32
  }
}

</mosaic_0001>

<bundles_post_ra>
// kernel: mul.44
= control target key start
LH: loop header
LB: loop body
LE: loop exit
PB: predicated region body
PF: predicated region fallthrough
CT: control target
= control target key end

     0   :  { %s34_s0 = inlined_call_operand.vmem [shape: f32[3], index: 0, kind: input, shape index: {}]   ;;  %s35_s1 = inlined_call_operand.vmem [shape: f32[3], index: 1, kind: input, shape index: {}]   ;;  %s36_s2 = inlined_call_operand.vmem [shape: f32[3], index: 2, kind: output, shape index: {}]  }
   0x1   :  { %v3_v0 = vld [vmem:[%s34_s0] sm:$0x1] }
   0x2   :  { %v4_v1 = vld [vmem:[%s35_s1] sm:$0x1] }
   0x3   :  { %v7_v2 = vmul.f32 %v4_v1, %v3_v0 }
   0x5   :  { %9 = vst [vmem:[%s36_s2] sm:$0x1] %v7_v2 }

// kernel: mul.3
= control target key start
LH: loop header
LB: loop body
LE: loop exit
PB: predicated region body
PF: predicated region fallthrough
CT: control target
= control target key end

     0   :  { %s34_s0 = inlined_call_operand.vmem [shape: f32[24], index: 0, kind: input, shape index: {}]   ;;  %s35_s1 = inlined_call_operand.vmem [shape: f32[24], index: 1, kind: input, shape index: {}]   ;;  %s36_s2 = inlined_call_operand.vmem [shape: f32[24], index: 2, kind: output, shape index: {}]  }
   0x1   :  { %v3_v0 = vld [vmem:[%s34_s0] sm:$0x1] }
   0x2   :  { %v4_v1 = vld [vmem:[%s35_s1] sm:$0x1] }
   0x3   :  { %v7_v2 = vmul.f32 %v4_v1, %v3_v0 }
   0x5   :  { %9 = vst [vmem:[%s36_s2] sm:$0x1] %v7_v2 }

// kernel: mul.1
= control target key start
LH: loop header
LB: loop body
LE: loop exit
PB: predicated region body
PF: predicated region fallthrough
CT: control target
= control target key end

     0   :  { %s34_s0 = inlined_call_operand.vmem [shape: f32[16], index: 0, kind: input, shape index: {}]   ;;  %s35_s1 = inlined_call_operand.vmem [shape: f32[16], index: 1, kind: input, shape index: {}]   ;;  %s36_s2 = inlined_call_operand.vmem [shape: f32[16], index: 2, kind: output, shape index: {}]  }
   0x1   :  { %v3_v0 = vld [vmem:[%s34_s0] sm:$0x1] }
   0x2   :  { %v4_v1 = vld [vmem:[%s35_s1] sm:$0x1] }
   0x3   :  { %v7_v2 = vmul.f32 %v4_v1, %v3_v0 }
   0x5   :  { %9 = vst [vmem:[%s36_s2] sm:$0x1] %v7_v2 }

// kernel: khar_kan_forward.1
= control target key start
LH: loop header
LB: loop body
LE: loop exit
PB: predicated region body
PF: predicated region fallthrough
CT: control target
= control target key end

     0   :  { %s768_s12 = smov [#allocation3]   ;;  %s1339_s0 = inlined_call_operand.vmem [shape: f32[110], index: 0, kind: input, shape index: {}]   ;;  %s1340_s1 = inlined_call_operand.vmem [shape: f32[2,16,128], index: 1, kind: input, shape index: {}]   ;;  %s1341_s2 = inlined_call_operand.vmem [shape: f32[1,16,128], index: 2, kind: output, shape index: {}]  }
   0x1   :  { %s8_s11 = sshll.u32 %s1339_s0, 4  ;;  %s9_s11 = int_to_ptr.vmem [resolvable:$true] %s8_s11 }
   0x2   :  { %11 = dma.vmem_to_smem %s9_s11, 16, %s768_s12, [#allocation2] }
   0x3   :  { %766 = dma.done.wait [#allocation2], 16 }
   0x4   :  { %767 = vsyncadd [#allocation2], 4294967280 }
   0x5   :  { %14 = sfence }
   0x6   :  { %s17_s13 = sld [smem:[#allocation3]]  ;;  %v806_v0 = vld [vmem:[%s1340_s1] sm:$0xff]  ;;  %v811_v1 = vld [vmem:[%s1340_s1 + $0x8] sm:$0xff]  ;;  %v816_v2 = vld [vmem:[%s1340_s1 + $0x10] sm:$0xff] }
   0x7   :  { %s642_s14 = sld [smem:[#allocation3 + $0x1]]  ;;  %v823_v4 = vld [vmem:[%s1340_s1 + $0x18] sm:$0xff] }
   0x8   :  { %s665_s15 = sld [smem:[#allocation3 + $0x18]] }
   0x9   :  { %s666_s16 = sld [smem:[#allocation3 + $0x19]] }
   0xa   :  { %s787_s17 = sld [smem:[#allocation3 + $0x1a]] }
   0xb   :  { %s789_s18 = sld [smem:[#allocation3 + $0x2]] }
   0xc   :  { %s791_s19 = sld [smem:[#allocation3 + $0x3]]  ;;  %v133_v9 = vstv %s17_s13 }
   0xd   :  { %s793_s20 = sld [smem:[#allocation3 + $0x28]]  ;;  %v139_v10 = vstv %s642_s14  ;;  %v134_v13 = vmul.f32 %v133_v9, %v806_v0  ;;  %v135_v14 = vmul.f32 %v133_v9, %v811_v1 }
   0xe   :  { %s795_s0 = sld [smem:[#allocation3 + $0x4]]  ;;  %v136_v3 = vstv %s665_s15  ;;  %v140_v15 = vmul.f32 %v816_v2, %v139_v10  ;;  %v141_v16 = vmul.f32 %v823_v4, %v139_v10 }
   0xf   :  { %s797_s21 = sld [smem:[#allocation3 + $0x10]]  ;;  %v137_v5 = vmul.f32 %v136_v3, %v806_v0  ;;  %v138_v6 = vmul.f32 %v136_v3, %v811_v1  ;;  %v144_v7 = vstv %s666_s16 }
  0x10   :  { %s799_s22 = sld [smem:[#allocation3 + $0x11]]  ;;  %v162_v8 = vstv %s787_s17  ;;  %v145_v11 = vmul.f32 %v816_v2, %v144_v7  ;;  %v146_v12 = vmul.f32 %v823_v4, %v144_v7  ;;  %v142_v21 = vadd.f32 %v140_v15, %v134_v13 }
  0x11   :  { %s801_s23 = sld [smem:[#allocation3 + $0x1b]]  ;;  %v159_v20 = vstv %s789_s18  ;;  %v143_v22 = vadd.f32 %v141_v16, %v135_v14  ;;  %v163_v28 = vmul.f32 %v162_v8, %v806_v0  ;;  %v164_v31 = vmul.f32 %v162_v8, %v811_v1 }
  0x12   :  { %s818_s30 = sld [smem:[#allocation3 + $0x29]]  ;;  %v147_v17 = vadd.f32 %v145_v11, %v137_v5  ;;  %v148_v18 = vadd.f32 %v146_v12, %v138_v6  ;;  %v160_v23 = vmul.f32 %v159_v20, %v806_v0  ;;  %v161_v24 = vmul.f32 %v159_v20, %v811_v1 }
  0x13   :  { %s830_s5 = sld [smem:[#allocation3 + $0x5]]  ;;  %v152_v19 = vstv %s793_s20  ;;  %v165_v32 = vstv %s791_s19 }
  0x14   :  { %s836_s1 = sld [smem:[#allocation3 + $0x1c]]  ;;  %v153_v26 = vadd.f32 %v152_v19, %v147_v17  ;;  %v154_v27 = vadd.f32 %v152_v19, %v148_v18  ;;  %v166_v35 = vmul.f32 %v816_v2, %v165_v32  ;;  %v167_v36 = vmul.f32 %v823_v4, %v165_v32 }
  0x15   :  { %s840_s6 = sld [smem:[#allocation3 + $0x12]]  ;;  %v149_v25 = vstv %s797_s21  ;;  %v185_v40 = vstv %s795_s0 }
  0x16   :  { %s844_s7 = sld [smem:[#allocation3 + $0x1d]]  ;;  %v150_v29 = vadd.f32 %v149_v25, %v142_v21  ;;  %v151_v30 = vadd.f32 %v149_v25, %v143_v22  ;;  %v155_v33 = vmul.f32 %v153_v26, %v153_v26  ;;  %v156_v34 = vmul.f32 %v154_v27, %v154_v27 }
  0x17   :  { %s848_s8 = sld [smem:[#allocation3 + $0x6]]  ;;  %v170_v37 = vstv %s801_s23  ;;  %v175_v38 = vstv %s799_s22  ;;  %v168_v43 = vadd.f32 %v166_v35, %v160_v23  ;;  %v169_v44 = vadd.f32 %v167_v36, %v161_v24 }
  0x18   :  { %s852_s9 = sld [smem:[#allocation3 + $0x2a]]  ;;  %v178_v39 = vstv %s818_s30  ;;  %v864_v41 = vadd.f32 %v155_v33, %v150_v29  ;;  %v866_v42 = vadd.f32 %v156_v34, %v151_v30  ;;  %v171_v45 = vmul.f32 %v816_v2, %v170_v37 }
  0x19   :  { %s856_s10 = sld [smem:[#allocation3 + $0x7]]  ;;  %v172_v46 = vmul.f32 %v823_v4, %v170_v37  ;;  %v186_v47 = vmul.f32 %v185_v40, %v806_v0  ;;  %v187_v48 = vmul.f32 %v185_v40, %v811_v1  ;;  %v176_v49 = vadd.f32 %v175_v38, %v168_v43 }
  0x1a   :  { %s862_s11 = sld [smem:[#allocation3 + $0x13]]  ;;  %v177_v50 = vadd.f32 %v175_v38, %v169_v44  ;;  %v188_v51 = vstv %s836_s1  ;;  %v191_v52 = vstv %s830_s5  ;;  %v173_v53 = vadd.f32 %v171_v45, %v163_v28 }
  0x1b   :  { %s868_s12 = sld [smem:[#allocation3 + $0x1e]]  ;;  %v174_v54 = vadd.f32 %v172_v46, %v164_v31  ;;  %v189_v55 = vmul.f32 %v188_v51, %v806_v0  ;;  %v190_v56 = vmul.f32 %v188_v51, %v811_v1  ;;  %v192_v57 = vmul.f32 %v816_v2, %v191_v52 }
  0x1c   :  { %s874_s13 = sld [smem:[#allocation3 + $0x1f]]  ;;  %v193_v58 = vmul.f32 %v823_v4, %v191_v52  ;;  %v196_v59 = vstv %s844_s7  ;;  %v201_v60 = vstv %s840_s6  ;;  %v179_v61 = vadd.f32 %v178_v39, %v173_v53 }
  0x1d   :  { %s880_s14 = sld [smem:[#allocation3 + $0x8]]  ;;  %v180_v62 = vadd.f32 %v178_v39, %v174_v54  ;;  %v197_v63 = vmul.f32 %v816_v2, %v196_v59  ;;  %v198_v3 = vmul.f32 %v823_v4, %v196_v59  ;;  %v194_v5 = vadd.f32 %v192_v57, %v186_v47 }
  0x1e   :  { %s886_s15 = sld [smem:[#allocation3 + $0x2b]]  ;;  %v195_v6 = vadd.f32 %v193_v58, %v187_v48  ;;  %v204_v7 = vstv %s852_s9  ;;  %v211_v8 = vstv %s848_s8  ;;  %v181_v9 = vmul.f32 %v179_v61, %v179_v61 }
  0x1f   :  { %s890_s16 = sld [smem:[#allocation3 + $0x9]]  ;;  %v182_v10 = vmul.f32 %v180_v62, %v180_v62  ;;  %v199_v11 = vadd.f32 %v197_v63, %v189_v55  ;;  %v200_v12 = vadd.f32 %v198_v3, %v190_v56  ;;  %v202_v13 = vadd.f32 %v201_v60, %v194_v5 }
  0x20   :  { %s894_s17 = sld [smem:[#allocation3 + $0x20]]  ;;  %v203_v14 = vadd.f32 %v201_v60, %v195_v6  ;;  %v212_v15 = vmul.f32 %v211_v8, %v806_v0  ;;  %v213_v16 = vmul.f32 %v211_v8, %v811_v1  ;;  %v900_v17 = vadd.f32 %v181_v9, %v176_v49 }
  0x21   :  { %s898_s18 = sld [smem:[#allocation3 + $0x14]]  ;;  %v902_v18 = vadd.f32 %v182_v10, %v177_v50  ;;  %v205_v19 = vadd.f32 %v204_v7, %v199_v11  ;;  %v206_v20 = vadd.f32 %v204_v7, %v200_v12  ;;  %v214_v21 = vstv %s868_s12 }
  0x22   :  { %s904_s19 = sld [smem:[#allocation3 + $0x21]]  ;;  %v217_v22 = vstv %s856_s10  ;;  %v222_v23 = vstv %s874_s13  ;;  %v227_v24 = vstv %s862_s11  ;;  %v215_v27 = vmul.f32 %v214_v21, %v806_v0 }
  0x23   :  { %s910_s20 = sld [smem:[#allocation3 + $0xa]]  ;;  %v207_v25 = vmul.f32 %v205_v19, %v205_v19  ;;  %v208_v26 = vmul.f32 %v206_v20, %v206_v20  ;;  %v216_v28 = vmul.f32 %v214_v21, %v811_v1  ;;  %v218_v29 = vmul.f32 %v816_v2, %v217_v22 }
  0x24   :  { %s914_s0 = sld [smem:[#allocation3 + $0x2c]]  ;;  %v219_v30 = vmul.f32 %v823_v4, %v217_v22  ;;  %v223_v31 = vmul.f32 %v816_v2, %v222_v23  ;;  %v224_v32 = vmul.f32 %v823_v4, %v222_v23  ;;  %v230_v35 = vstv %s886_s15 }
  0x25   :  { %s920_s21 = sld [smem:[#allocation3 + $0xb]]  ;;  %v922_v33 = vadd.f32 %v207_v25, %v202_v13  ;;  %v924_v34 = vadd.f32 %v208_v26, %v203_v14  ;;  %v237_v36 = vstv %s880_s14  ;;  %v220_v37 = vadd.f32 %v218_v29, %v212_v15 }
  0x26   :  { %s928_s22 = sld [smem:[#allocation3 + $0x22]]  ;;  %v221_v38 = vadd.f32 %v219_v30, %v213_v16  ;;  %v225_v39 = vadd.f32 %v223_v31, %v215_v27  ;;  %v226_v40 = vadd.f32 %v224_v32, %v216_v28  ;;  %v238_v43 = vmul.f32 %v237_v36, %v806_v0 }
  0x27   :  { %s930_s23 = sld [smem:[#allocation3 + $0x15]]  ;;  %v239_v44 = vmul.f32 %v237_v36, %v811_v1  ;;  %v240_v45 = vstv %s894_s17  ;;  %v243_v46 = vstv %s890_s16  ;;  %v228_v47 = vadd.f32 %v227_v24, %v220_v37 }
  0x28   :  { %s936_s24 = sld [smem:[#allocation3 + $0x23]]  ;;  %v229_v48 = vadd.f32 %v227_v24, %v221_v38  ;;  %v231_v49 = vadd.f32 %v230_v35, %v225_v39  ;;  %v232_v50 = vadd.f32 %v230_v35, %v226_v40  ;;  %v241_v51 = vmul.f32 %v240_v45, %v806_v0 }
  0x29   :  { %s938_s25 = sld [smem:[#allocation3 + $0xc]]  ;;  %v242_v52 = vmul.f32 %v240_v45, %v811_v1  ;;  %v244_v53 = vmul.f32 %v816_v2, %v243_v46  ;;  %v245_v54 = vmul.f32 %v823_v4, %v243_v46  ;;  %v248_v57 = vstv %s904_s19 }
  0x2a   :  { %s944_s26 = sld [smem:[#allocation3 + $0x2d]]  ;;  %v233_v55 = vmul.f32 %v231_v49, %v231_v49  ;;  %v234_v56 = vmul.f32 %v232_v50, %v232_v50  ;;  %v253_v58 = vstv %s898_s18  ;;  %v249_v61 = vmul.f32 %v816_v2, %v248_v57 }
  0x2b   :  { %v246_v59 = vadd.f32 %v244_v53, %v238_v43  ;;  %v247_v60 = vadd.f32 %v245_v54, %v239_v44  ;;  %v250_v62 = vmul.f32 %v823_v4, %v248_v57  ;;  %s950_s27 = sld [smem:[#allocation3 + $0xd]]  ;;  %v256_v5 = vstv %s914_s0 }
  0x2c   :  { %v952_v63 = vadd.f32 %v233_v55, %v228_v47  ;;  %v954_v3 = vadd.f32 %v234_v56, %v229_v48  ;;  %v263_v6 = vstv %s910_s20  ;;  %s958_s28 = sld [smem:[#allocation3 + $0x24]]  ;;  %v251_v7 = vadd.f32 %v249_v61, %v241_v51 }
  0x2d   :  { %v252_v8 = vadd.f32 %v250_v62, %v242_v52  ;;  %v254_v9 = vadd.f32 %v253_v58, %v246_v59  ;;  %v255_v10 = vadd.f32 %v253_v58, %v247_v60  ;;  %s960_s29 = sld [smem:[#allocation3 + $0x16]]  ;;  %v264_v11 = vmul.f32 %v263_v6, %v806_v0 }
  0x2e   :  { %v265_v12 = vmul.f32 %v263_v6, %v811_v1  ;;  %v266_v13 = vstv %s928_s22  ;;  %v269_v14 = vstv %s920_s21  ;;  %s966_s30 = sld [smem:[#allocation3 + $0x25]]  ;;  %v257_v15 = vadd.f32 %v256_v5, %v251_v7 }
  0x2f   :  { %v258_v16 = vadd.f32 %v256_v5, %v252_v8  ;;  %v267_v19 = vmul.f32 %v266_v13, %v806_v0  ;;  %v268_v20 = vmul.f32 %v266_v13, %v811_v1  ;;  %s970_s3 = sld [smem:[#allocation3 + $0xe]]  ;;  %v270_v21 = vmul.f32 %v816_v2, %v269_v14 }
  0x30   :  { %v271_v22 = vmul.f32 %v823_v4, %v269_v14  ;;  %v274_v23 = vstv %s936_s24  ;;  %v279_v24 = vstv %s930_s23  ;;  %s976_s4 = sld [smem:[#allocation3 + $0x2e]]  ;;  %v259_v25 = vmul.f32 %v257_v15, %v257_v15 }
  0x31   :  { %v260_v26 = vmul.f32 %v258_v16, %v258_v16  ;;  %v275_v27 = vmul.f32 %v816_v2, %v274_v23  ;;  %v276_v28 = vmul.f32 %v823_v4, %v274_v23  ;;  %s980_s5 = sld [smem:[#allocation3 + $0xf]]  ;;  %v272_v29 = vadd.f32 %v270_v21, %v264_v11 }
  0x32   :  { %v273_v30 = vadd.f32 %v271_v22, %v265_v12  ;;  %v282_v31 = vstv %s944_s26  ;;  %v289_v32 = vstv %s938_s25  ;;  %s984_s1 = sld [smem:[#allocation3 + $0x26]]  ;;  %v986_v35 = vadd.f32 %v259_v25, %v254_v9 }
  0x33   :  { %v988_v36 = vadd.f32 %v260_v26, %v255_v10  ;;  %v277_v37 = vadd.f32 %v275_v27, %v267_v19  ;;  %v278_v38 = vadd.f32 %v276_v28, %v268_v20  ;;  %s990_s6 = sld [smem:[#allocation3 + $0x17]]  ;;  %v280_v39 = vadd.f32 %v279_v24, %v272_v29 }
  0x34   :  { %v281_v40 = vadd.f32 %v279_v24, %v273_v30  ;;  %v290_v43 = vmul.f32 %v289_v32, %v806_v0  ;;  %v291_v44 = vmul.f32 %v289_v32, %v811_v1  ;;  %s994_s7 = sld [smem:[#allocation3 + $0x27]]  ;;  %v292_v47 = vstv %s958_s28 }
  0x35   :  { %v283_v45 = vadd.f32 %v282_v31, %v277_v37  ;;  %v284_v46 = vadd.f32 %v282_v31, %v278_v38  ;;  %v295_v48 = vstv %s950_s27  ;;  %s998_s8 = sld [smem:[#allocation3 + $0x2f]]  ;;  %v293_v49 = vmul.f32 %v292_v47, %v806_v0 }
  0x36   :  { %v294_v50 = vmul.f32 %v292_v47, %v811_v1  ;;  %v296_v51 = vmul.f32 %v816_v2, %v295_v48  ;;  %v297_v52 = vmul.f32 %v823_v4, %v295_v48  ;;  %s1004_s9 = sld [smem:[#allocation3 + $0x30]]  ;;  %v300_v55 = vstv %s966_s30 }
  0x37   :  { %v285_v53 = vmul.f32 %v283_v45, %v283_v45  ;;  %v286_v54 = vmul.f32 %v284_v46, %v284_v46  ;;  %v305_v56 = vstv %s960_s29  ;;  %v301_v59 = vmul.f32 %v816_v2, %v300_v55  ;;  %s1010_s10 = sld [smem:[#allocation3 + $0x31]] }
  0x38   :  { %v298_v57 = vadd.f32 %v296_v51, %v290_v43  ;;  %v299_v58 = vadd.f32 %v297_v52, %v291_v44  ;;  %v302_v60 = vmul.f32 %v823_v4, %v300_v55  ;;  %v308_v5 = vstv %s976_s4  ;;  %s1018_s11 = sld [smem:[#allocation3 + $0x4b]] }
  0x39   :  { %v1012_v61 = vadd.f32 %v285_v53, %v280_v39  ;;  %v1014_v62 = vadd.f32 %v286_v54, %v281_v40  ;;  %v315_v6 = vstv %s970_s3  ;;  %v303_v7 = vadd.f32 %v301_v59, %v293_v49  ;;  %s1020_s12 = sld [smem:[#allocation3 + $0x32]] }
  0x3a   :  { %v304_v8 = vadd.f32 %v302_v60, %v294_v50  ;;  %v306_v9 = vadd.f32 %v305_v56, %v298_v57  ;;  %v307_v10 = vadd.f32 %v305_v56, %v299_v58  ;;  %v316_v11 = vmul.f32 %v315_v6, %v806_v0  ;;  %s1026_s13 = sld [smem:[#allocation3 + $0x4c]] }
  0x3b   :  { %v317_v12 = vmul.f32 %v315_v6, %v811_v1  ;;  %v318_v13 = vstv %s984_s1  ;;  %v321_v14 = vstv %s980_s5  ;;  %v309_v15 = vadd.f32 %v308_v5, %v303_v7  ;;  %s1034_s14 = sld [smem:[#allocation3 + $0x33]] }
  0x3c   :  { %v310_v16 = vadd.f32 %v308_v5, %v304_v8  ;;  %v319_v19 = vmul.f32 %v318_v13, %v806_v0  ;;  %v320_v20 = vmul.f32 %v318_v13, %v811_v1  ;;  %v322_v21 = vmul.f32 %v816_v2, %v321_v14  ;;  %s1038_s15 = sld [smem:[#allocation3 + $0x4d]] }
  0x3d   :  { %v323_v22 = vmul.f32 %v823_v4, %v321_v14  ;;  %v326_v23 = vstv %s994_s7  ;;  %v331_v24 = vstv %s990_s6  ;;  %v311_v25 = vmul.f32 %v309_v15, %v309_v15  ;;  %s1042_s16 = sld [smem:[#allocation3 + $0x34]] }
  0x3e   :  { %v312_v26 = vmul.f32 %v310_v16, %v310_v16  ;;  %v327_v27 = vmul.f32 %v816_v2, %v326_v23  ;;  %v328_v28 = vmul.f32 %v823_v4, %v326_v23  ;;  %v324_v29 = vadd.f32 %v322_v21, %v316_v11  ;;  %s1048_s17 = sld [smem:[#allocation3 + $0x4e]] }
  0x3f   :  { %v325_v0 = vadd.f32 %v323_v22, %v317_v12  ;;  %v334_v1 = vstv %s998_s8  ;;  %v341_v30 = vstv %s1004_s9  ;;  %v1044_v31 = vadd.f32 %v311_v25, %v306_v9  ;;  %s1054_s18 = sld [smem:[#allocation3 + $0x35]] }
  0x40   :  { %v1046_v32 = vadd.f32 %v312_v26, %v307_v10  ;;  %v329_v37 = vadd.f32 %v327_v27, %v319_v19  ;;  %v330_v38 = vadd.f32 %v328_v28, %v320_v20  ;;  %v332_v2 = vadd.f32 %v331_v24, %v324_v29  ;;  %s1060_s19 = sld [smem:[#allocation3 + $0x4f]] }
  0x41   :  { %v333_v4 = vadd.f32 %v331_v24, %v325_v0  ;;  %v342_v39 = vmul.f32 %v341_v30, %v864_v41  ;;  %v343_v40 = vmul.f32 %v341_v30, %v866_v42  ;;  %v344_v45 = vstv %s1018_s11  ;;  %s1064_s20 = sld [smem:[#allocation3 + $0x36]] }
  0x42   :  { %v335_v43 = vadd.f32 %v334_v1, %v329_v37  ;;  %v336_v44 = vadd.f32 %v334_v1, %v330_v38  ;;  %v347_v46 = vstv %s1010_s10  ;;  %v345_v47 = vmul.f32 %v344_v45, %v864_v41  ;;  %s1068_s0 = sld [smem:[#allocation3 + $0x50]] }
  0x43   :  { %v346_v48 = vmul.f32 %v344_v45, %v866_v42  ;;  %v348_v49 = vmul.f32 %v347_v46, %v900_v17  ;;  %v349_v50 = vmul.f32 %v347_v46, %v902_v18  ;;  %v352_v53 = vstv %s1026_s13  ;;  %s1078_s21 = sld [smem:[#allocation3 + $0x37]] }
  0x44   :  { %v337_v51 = vmul.f32 %v335_v43, %v335_v43  ;;  %v338_v52 = vmul.f32 %v336_v44, %v336_v44  ;;  %v357_v54 = vstv %s1020_s12  ;;  %v353_v57 = vmul.f32 %v352_v53, %v900_v17  ;;  %s1082_s22 = sld [smem:[#allocation3 + $0x51]] }
  0x45   :  { %v350_v55 = vadd.f32 %v348_v49, %v342_v39  ;;  %v351_v56 = vadd.f32 %v349_v50, %v343_v40  ;;  %v354_v58 = vmul.f32 %v352_v53, %v902_v18  ;;  %v358_v5 = vmul.f32 %v357_v54, %v922_v33  ;;  %s1088_s23 = sld [smem:[#allocation3 + $0x48]] }
  0x46   :  { %v1070_v59 = vadd.f32 %v337_v51, %v332_v2  ;;  %v1072_v60 = vadd.f32 %v338_v52, %v333_v4  ;;  %v359_v6 = vmul.f32 %v357_v54, %v924_v34  ;;  %v355_v7 = vadd.f32 %v353_v57, %v345_v47  ;;  %s1092_s24 = sld [smem:[#allocation3 + $0x52]] }
  0x47   :  { %v356_v8 = vadd.f32 %v354_v58, %v346_v48  ;;  %v362_v9 = vstv %s1038_s15  ;;  %v367_v10 = vstv %s1034_s14  ;;  %v360_v11 = vadd.f32 %v358_v5, %v350_v55  ;;  %s1096_s25 = sld [smem:[#allocation3 + $0x38]] }
  0x48   :  { %v361_v12 = vadd.f32 %v359_v6, %v351_v56  ;;  %v363_v13 = vmul.f32 %v362_v9, %v922_v33  ;;  %v364_v14 = vmul.f32 %v362_v9, %v924_v34  ;;  %v368_v15 = vmul.f32 %v367_v10, %v952_v63  ;;  %s1100_s26 = sld [smem:[#allocation3 + $0x63]] }
  0x49   :  { %v369_v16 = vmul.f32 %v367_v10, %v954_v3  ;;  %v372_v19 = vstv %s1048_s17  ;;  %v377_v20 = vstv %s1042_s16  ;;  %v382_v1 = vstv %s1060_s19  ;;  %s1104_s27 = sld [smem:[#allocation3 + $0x39]] }
  0x4a   :  { %v365_v21 = vadd.f32 %v363_v13, %v355_v7  ;;  %v366_v22 = vadd.f32 %v364_v14, %v356_v8  ;;  %v373_v23 = vmul.f32 %v372_v19, %v952_v63  ;;  %v374_v24 = vmul.f32 %v372_v19, %v954_v3  ;;  %s1110_s28 = sld [smem:[#allocation3 + $0x53]] }
  0x4b   :  { %v370_v25 = vadd.f32 %v368_v15, %v360_v11  ;;  %v371_v26 = vadd.f32 %v369_v16, %v361_v12  ;;  %v378_v27 = vmul.f32 %v377_v20, %v986_v35  ;;  %v379_v28 = vmul.f32 %v377_v20, %v988_v36  ;;  %s1114_s29 = sld [smem:[#allocation3 + $0x3a]] }
  0x4c   :  { %v375_v29 = vadd.f32 %v373_v23, %v365_v21  ;;  %v376_v0 = vadd.f32 %v374_v24, %v366_v22  ;;  %v387_v30 = vstv %s1054_s18  ;;  %v383_v2 = vmul.f32 %v382_v1, %v986_v35  ;;  %s1118_s30 = sld [smem:[#allocation3 + $0x54]] }
  0x4d   :  { %v380_v37 = vadd.f32 %v378_v27, %v370_v25  ;;  %v381_v38 = vadd.f32 %v379_v28, %v371_v26  ;;  %v384_v4 = vmul.f32 %v382_v1, %v988_v36  ;;  %v388_v39 = vmul.f32 %v387_v30, %v1012_v61  ;;  %s1122_s3 = sld [smem:[#allocation3 + $0x3b]] }
  0x4e   :  { %v389_v40 = vmul.f32 %v387_v30, %v1014_v62  ;;  %v392_v43 = vstv %s1068_s0  ;;  %v397_v44 = vstv %s1064_s20  ;;  %v385_v45 = vadd.f32 %v383_v2, %v375_v29  ;;  %s1126_s4 = sld [smem:[#allocation3 + $0x3c]] }
  0x4f   :  { %v386_v46 = vadd.f32 %v384_v4, %v376_v0  ;;  %v393_v47 = vmul.f32 %v392_v43, %v1012_v61  ;;  %v394_v48 = vmul.f32 %v392_v43, %v1014_v62  ;;  %v390_v49 = vadd.f32 %v388_v39, %v380_v37  ;;  %s1132_s5 = sld [smem:[#allocation3 + $0x3d]] }
  0x50   :  { %v391_v50 = vadd.f32 %v389_v40, %v381_v38  ;;  %v398_v51 = vmul.f32 %v397_v44, %v1044_v31  ;;  %v399_v52 = vmul.f32 %v397_v44, %v1046_v32  ;;  %v402_v55 = vstv %s1082_s22  ;;  %s1136_s1 = sld [smem:[#allocation3 + $0x55]] }
  0x51   :  { %v395_v53 = vadd.f32 %v393_v47, %v385_v45  ;;  %v396_v54 = vadd.f32 %v394_v48, %v386_v46  ;;  %v407_v56 = vstv %s1078_s21  ;;  %v403_v5 = vmul.f32 %v402_v55, %v1044_v31  ;;  %s1140_s6 = sld [smem:[#allocation3 + $0x56]] }
  0x52   :  { %v400_v57 = vadd.f32 %v398_v51, %v390_v49  ;;  %v401_v58 = vadd.f32 %v399_v52, %v391_v50  ;;  %v404_v6 = vmul.f32 %v402_v55, %v1046_v32  ;;  %v408_v7 = vmul.f32 %v407_v56, %v1070_v59  ;;  %s1144_s7 = sld [smem:[#allocation3 + $0x57]] }
  0x53   :  { %v409_v8 = vmul.f32 %v407_v56, %v1072_v60  ;;  %v412_v9 = vstv %s1092_s24  ;;  %v417_v10 = vstv %s1088_s23  ;;  %v405_v11 = vadd.f32 %v403_v5, %v395_v53  ;;  %s1150_s8 = sld [smem:[#allocation3 + $0x3e]] }
  0x54   :  { %v406_v12 = vadd.f32 %v404_v6, %v396_v54  ;;  %v413_v13 = vmul.f32 %v412_v9, %v1070_v59  ;;  %v414_v14 = vmul.f32 %v412_v9, %v1072_v60  ;;  %v410_v15 = vadd.f32 %v408_v7, %v400_v57  ;;  %s1156_s9 = sld [smem:[#allocation3 + $0x3f]] }
  0x55   :  { %v411_v16 = vadd.f32 %v409_v8, %v401_v58  ;;  %v420_v19 = vstv %s1100_s26  ;;  %v427_v20 = vstv %s1096_s25  ;;  %v430_v27 = vstv %s1110_s28  ;;  %s1160_s10 = sld [smem:[#allocation3 + $0x58]] }
  0x56   :  { %v415_v21 = vadd.f32 %v413_v13, %v405_v11  ;;  %v416_v22 = vadd.f32 %v414_v14, %v406_v12  ;;  %v428_v23 = vmul.f32 %v427_v20, %v864_v41  ;;  %v429_v24 = vmul.f32 %v427_v20, %v866_v42  ;;  %s1164_s11 = sld [smem:[#allocation3 + $0x59]] }
  0x57   :  { %v418_v25 = vadd.f32 %v417_v10, %v410_v15  ;;  %v419_v26 = vadd.f32 %v417_v10, %v411_v16  ;;  %v433_v28 = vstv %s1104_s27  ;;  %v431_v1 = vmul.f32 %v430_v27, %v864_v41  ;;  %s1172_s12 = sld [smem:[#allocation3 + $0x40]] }
  0x58   :  { %v421_v29 = vadd.f32 %v420_v19, %v415_v21  ;;  %v422_v0 = vadd.f32 %v420_v19, %v416_v22  ;;  %v432_v30 = vmul.f32 %v430_v27, %v866_v42  ;;  %v434_v37 = vmul.f32 %v433_v28, %v900_v17  ;;  %s1178_s13 = sld [smem:[#allocation3 + $0x49]] }
  0x59   :  { %v435_v38 = vmul.f32 %v433_v28, %v902_v18  ;;  %v438_v2 = vstv %s1118_s30  ;;  %v443_v4 = vstv %s1114_s29  ;;  %v448_v55 = vstv %s1136_s1  ;;  %s1184_s14 = sld [smem:[#allocation3 + $0x5a]] }
  0x5a   :  { %v423_v39 = vmul.f32 %v421_v29, %v421_v29  ;;  %v424_v40 = vmul.f32 %v422_v0, %v422_v0  ;;  %v439_v43 = vmul.f32 %v438_v2, %v900_v17  ;;  %v440_v44 = vmul.f32 %v438_v2, %v902_v18  ;;  %s1186_s15 = sld [smem:[#allocation3 + $0x64]] }
  0x5b   :  { %v436_v45 = vadd.f32 %v434_v37, %v428_v23  ;;  %v437_v46 = vadd.f32 %v435_v38, %v429_v24  ;;  %v444_v47 = vmul.f32 %v443_v4, %v922_v33  ;;  %v445_v48 = vmul.f32 %v443_v4, %v924_v34  ;;  %s1196_s16 = sld [smem:[#allocation3 + $0x41]] }
  0x5c   :  { %v1166_v49 = vadd.f32 %v423_v39, %v418_v25  ;;  %v1168_v50 = vadd.f32 %v424_v40, %v419_v26  ;;  %v441_v51 = vadd.f32 %v439_v43, %v431_v1  ;;  %v442_v52 = vadd.f32 %v440_v44, %v432_v30  ;;  %s1198_s17 = sld [smem:[#allocation3 + $0x5b]] }
  0x5d   :  { %v446_v53 = vadd.f32 %v444_v47, %v436_v45  ;;  %v447_v54 = vadd.f32 %v445_v48, %v437_v46  ;;  %v453_v56 = vstv %s1122_s3  ;;  %v449_v57 = vmul.f32 %v448_v55, %v922_v33  ;;  %s1204_s18 = sld [smem:[#allocation3 + $0x42]] }
  0x5e   :  { %v450_v58 = vmul.f32 %v448_v55, %v924_v34  ;;  %v454_v5 = vmul.f32 %v453_v56, %v952_v63  ;;  %v455_v6 = vmul.f32 %v453_v56, %v954_v3  ;;  %v458_v7 = vstv %s1140_s6  ;;  %s1206_s19 = sld [smem:[#allocation3 + $0x5c]] }
  0x5f   :  { %v463_v8 = vstv %s1126_s4  ;;  %v468_v9 = vstv %s1144_s7  ;;  %v473_v10 = vstv %s1132_s5  ;;  %v451_v11 = vadd.f32 %v449_v57, %v441_v51  ;;  %s1216_s20 = sld [smem:[#allocation3 + $0x43]] }
  0x60   :  { %v452_v12 = vadd.f32 %v450_v58, %v442_v52  ;;  %v456_v13 = vadd.f32 %v454_v5, %v446_v53  ;;  %v457_v14 = vadd.f32 %v455_v6, %v447_v54  ;;  %v459_v15 = vmul.f32 %v458_v7, %v952_v63  ;;  %s1222_s0 = sld [smem:[#allocation3 + $0x5d]] }
  0x61   :  { %v460_v16 = vmul.f32 %v458_v7, %v954_v3  ;;  %v464_v19 = vmul.f32 %v463_v8, %v986_v35  ;;  %v465_v20 = vmul.f32 %v463_v8, %v988_v36  ;;  %v469_v21 = vmul.f32 %v468_v9, %v986_v35  ;;  %s1224_s21 = sld [smem:[#allocation3 + $0x44]] }
  0x62   :  { %v470_v22 = vmul.f32 %v468_v9, %v988_v36  ;;  %v474_v23 = vmul.f32 %v473_v10, %v1012_v61  ;;  %v475_v24 = vmul.f32 %v473_v10, %v1014_v62  ;;  %v461_v25 = vadd.f32 %v459_v15, %v451_v11  ;;  %s1230_s22 = sld [smem:[#allocation3 + $0x5e]] }
  0x63   :  { %v462_v26 = vadd.f32 %v460_v16, %v452_v12  ;;  %v466_v27 = vadd.f32 %v464_v19, %v456_v13  ;;  %v467_v28 = vadd.f32 %v465_v20, %v457_v14  ;;  %v478_v29 = vstv %s1160_s10  ;;  %s1236_s23 = sld [smem:[#allocation3 + $0x45]] }
  0x64   :  { %v483_v0 = vstv %s1150_s8  ;;  %v488_v1 = vstv %s1164_s11  ;;  %v493_v30 = vstv %s1156_s9  ;;  %v471_v37 = vadd.f32 %v469_v21, %v461_v25  ;;  %s1242_s24 = sld [smem:[#allocation3 + $0x5f]] }
  0x65   :  { %v472_v38 = vadd.f32 %v470_v22, %v462_v26  ;;  %v476_v2 = vadd.f32 %v474_v23, %v466_v27  ;;  %v477_v4 = vadd.f32 %v475_v24, %v467_v28  ;;  %v479_v39 = vmul.f32 %v478_v29, %v1012_v61  ;;  %s1246_s25 = sld [smem:[#allocation3 + $0x46]] }
  0x66   :  { %v480_v40 = vmul.f32 %v478_v29, %v1014_v62  ;;  %v484_v43 = vmul.f32 %v483_v0, %v1044_v31  ;;  %v485_v44 = vmul.f32 %v483_v0, %v1046_v32  ;;  %v489_v45 = vmul.f32 %v488_v1, %v1044_v31  ;;  %s1250_s26 = sld [smem:[#allocation3 + $0x60]] }
  0x67   :  { %v490_v46 = vmul.f32 %v488_v1, %v1046_v32  ;;  %v494_v47 = vmul.f32 %v493_v30, %v1070_v59  ;;  %v495_v48 = vmul.f32 %v493_v30, %v1072_v60  ;;  %v481_v51 = vadd.f32 %v479_v39, %v471_v37  ;;  %s1254_s27 = sld [smem:[#allocation3 + $0x47]] }
  0x68   :  { %v482_v52 = vadd.f32 %v480_v40, %v472_v38  ;;  %v486_v53 = vadd.f32 %v484_v43, %v476_v2  ;;  %v487_v54 = vadd.f32 %v485_v44, %v477_v4  ;;  %v498_v55 = vstv %s1184_s14  ;;  %s1262_s28 = sld [smem:[#allocation3 + $0x61]] }
  0x69   :  { %v503_v56 = vstv %s1178_s13  ;;  %v506_v57 = vstv %s1186_s15  ;;  %v513_v58 = vstv %s1172_s12  ;;  %v491_v5 = vadd.f32 %v489_v45, %v481_v51  ;;  %s1268_s29 = sld [smem:[#allocation3 + $0x4a]] }
  0x6a   :  { %v492_v6 = vadd.f32 %v490_v46, %v482_v52  ;;  %v496_v7 = vadd.f32 %v494_v47, %v486_v53  ;;  %v497_v8 = vadd.f32 %v495_v48, %v487_v54  ;;  %v499_v9 = vmul.f32 %v498_v55, %v1070_v59  ;;  %s1272_s30 = sld [smem:[#allocation3 + $0x62]] }
  0x6b   :  { %v500_v10 = vmul.f32 %v498_v55, %v1072_v60  ;;  %v514_v11 = vmul.f32 %v513_v58, %v864_v41  ;;  %v515_v12 = vmul.f32 %v513_v58, %v866_v42  ;;  %v516_v15 = vstv %s1198_s17  ;;  %s1276_s3 = sld [smem:[#allocation3 + $0x65]] }
  0x6c   :  { %v504_v13 = vadd.f32 %v503_v56, %v496_v7  ;;  %v505_v14 = vadd.f32 %v503_v56, %v497_v8  ;;  %v519_v16 = vstv %s1196_s16  ;;  %v501_v19 = vadd.f32 %v499_v9, %v491_v5  ;;  %s1280_s4 = sld [smem:[#allocation3 + $0x66]] }
  0x6d   :  { %v502_v20 = vadd.f32 %v500_v10, %v492_v6  ;;  %v517_v21 = vmul.f32 %v516_v15, %v864_v41  ;;  %v518_v22 = vmul.f32 %v516_v15, %v866_v42  ;;  %v520_v23 = vmul.f32 %v519_v16, %v900_v17  ;;  %s1284_s5 = sld [smem:[#allocation3 + $0x67]] }
  0x6e   :  { %v521_v24 = vmul.f32 %v519_v16, %v902_v18  ;;  %v524_v25 = vstv %s1206_s19  ;;  %v529_v26 = vstv %s1204_s18  ;;  %v507_v27 = vadd.f32 %v506_v57, %v501_v19  ;;  %s1290_s1 = sld [smem:[#allocation3 + $0x6a]] }
  0x6f   :  { %v508_v28 = vadd.f32 %v506_v57, %v502_v20  ;;  %v525_v29 = vmul.f32 %v524_v25, %v900_v17  ;;  %v526_v41 = vmul.f32 %v524_v25, %v902_v18  ;;  %v522_v42 = vadd.f32 %v520_v23, %v514_v11  ;;  %s1296_s6 = sld [smem:[#allocation3 + $0x6b]] }
  0x70   :  { %v523_v0 = vadd.f32 %v521_v24, %v515_v12  ;;  %v530_v1 = vmul.f32 %v529_v26, %v922_v33  ;;  %v531_v30 = vmul.f32 %v529_v26, %v924_v34  ;;  %v509_v37 = vmul.f32 %v507_v27, %v507_v27  ;;  %s1300_s7 = sld [smem:[#allocation3 + $0x68]] }
  0x71   :  { %v510_v38 = vmul.f32 %v508_v28, %v508_v28  ;;  %v527_v2 = vadd.f32 %v525_v29, %v517_v21  ;;  %v528_v4 = vadd.f32 %v526_v41, %v518_v22  ;;  %v534_v40 = vstv %s1222_s0  ;;  %s1304_s8 = sld [smem:[#allocation3 + $0x6c]] }
  0x72   :  { %v532_v39 = vadd.f32 %v530_v1, %v522_v42  ;;  %v533_v17 = vadd.f32 %v531_v30, %v523_v0  ;;  %v539_v18 = vstv %s1216_s20  ;;  %v1256_v43 = vadd.f32 %v509_v37, %v504_v13  ;;  %s1314_s9 = sld [smem:[#allocation3 + $0x69]] }
  0x73   :  { %v1258_v44 = vadd.f32 %v510_v38, %v505_v14  ;;  %v535_v45 = vmul.f32 %v534_v40, %v922_v33  ;;  %v536_v46 = vmul.f32 %v534_v40, %v924_v34  ;;  %v540_v47 = vmul.f32 %v539_v18, %v952_v63  ;;  %s1318_s10 = sld [smem:[#allocation3 + $0x6d]] }
  0x74   :  { %v541_v48 = vmul.f32 %v539_v18, %v954_v3  ;;  %v544_v51 = vstv %s1230_s22  ;;  %v549_v52 = vstv %s1224_s21  ;;  %v554_v7 = vstv %s1242_s24 }
  0x75   :  { %v537_v53 = vadd.f32 %v535_v45, %v527_v2  ;;  %v538_v54 = vadd.f32 %v536_v46, %v528_v4  ;;  %v545_v55 = vmul.f32 %v544_v51, %v952_v63  ;;  %v546_v33 = vmul.f32 %v544_v51, %v954_v3 }
  0x76   :  { %v542_v34 = vadd.f32 %v540_v47, %v532_v39  ;;  %v543_v56 = vadd.f32 %v541_v48, %v533_v17  ;;  %v550_v57 = vmul.f32 %v549_v52, %v986_v35  ;;  %v551_v58 = vmul.f32 %v549_v52, %v988_v36 }
  0x77   :  { %v547_v5 = vadd.f32 %v545_v55, %v537_v53  ;;  %v548_v6 = vadd.f32 %v546_v33, %v538_v54  ;;  %v559_v8 = vstv %s1236_s23  ;;  %v555_v9 = vmul.f32 %v554_v7, %v986_v35 }
  0x78   :  { %v552_v63 = vadd.f32 %v550_v57, %v542_v34  ;;  %v553_v3 = vadd.f32 %v551_v58, %v543_v56  ;;  %v556_v10 = vmul.f32 %v554_v7, %v988_v36  ;;  %v560_v11 = vmul.f32 %v559_v8, %v1012_v61 }
  0x79   :  { %v561_v12 = vmul.f32 %v559_v8, %v1014_v62  ;;  %v564_v13 = vstv %s1250_s26  ;;  %v569_v14 = vstv %s1246_s25  ;;  %v557_v15 = vadd.f32 %v555_v9, %v547_v5 }
  0x7a   :  { %v558_v16 = vadd.f32 %v556_v10, %v548_v6  ;;  %v565_v19 = vmul.f32 %v564_v13, %v1012_v61  ;;  %v566_v35 = vmul.f32 %v564_v13, %v1014_v62  ;;  %v562_v20 = vadd.f32 %v560_v11, %v552_v63 }
  0x7b   :  { %v563_v36 = vadd.f32 %v561_v12, %v553_v3  ;;  %v570_v21 = vmul.f32 %v569_v14, %v1044_v31  ;;  %v571_v22 = vmul.f32 %v569_v14, %v1046_v32  ;;  %v574_v25 = vstv %s1262_s28 }
  0x7c   :  { %v567_v23 = vadd.f32 %v565_v19, %v557_v15  ;;  %v568_v24 = vadd.f32 %v566_v35, %v558_v16  ;;  %v579_v26 = vstv %s1254_s27  ;;  %v575_v27 = vmul.f32 %v574_v25, %v1044_v31 }
  0x7d   :  { %v572_v61 = vadd.f32 %v570_v21, %v562_v20  ;;  %v573_v62 = vadd.f32 %v571_v22, %v563_v36  ;;  %v576_v28 = vmul.f32 %v574_v25, %v1046_v32  ;;  %v580_v29 = vmul.f32 %v579_v26, %v1070_v59 }
  0x7e   :  { %v581_v41 = vmul.f32 %v579_v26, %v1072_v60  ;;  %v584_v42 = vstv %s1272_s30  ;;  %v589_v0 = vstv %s1268_s29  ;;  %v577_v1 = vadd.f32 %v575_v27, %v567_v23 }
  0x7f   :  { %v578_v30 = vadd.f32 %v576_v28, %v568_v24  ;;  %v585_v37 = vmul.f32 %v584_v42, %v1070_v59  ;;  %v586_v38 = vmul.f32 %v584_v42, %v1072_v60  ;;  %v582_v2 = vadd.f32 %v580_v29, %v572_v61 }
  0x80   :  { %v583_v31 = vadd.f32 %v581_v41, %v573_v62  ;;  %v592_v4 = vstv %s1276_s3  ;;  %v599_v32 = vstv %s1280_s4  ;;  %v602_v59 = vstv %s1290_s1 }
  0x81   :  { %v587_v39 = vadd.f32 %v585_v37, %v577_v1  ;;  %v588_v17 = vadd.f32 %v586_v38, %v578_v30  ;;  %v600_v40 = vmul.f32 %v599_v32, %v1166_v49  ;;  %v601_v18 = vmul.f32 %v599_v32, %v1168_v50 }
  0x82   :  { %v590_v45 = vadd.f32 %v589_v0, %v582_v2  ;;  %v591_v46 = vadd.f32 %v589_v0, %v583_v31  ;;  %v605_v60 = vstv %s1284_s5  ;;  %v603_v51 = vmul.f32 %v602_v59, %v1166_v49 }
  0x83   :  { %v593_v47 = vadd.f32 %v592_v4, %v587_v39  ;;  %v594_v48 = vadd.f32 %v592_v4, %v588_v17  ;;  %v604_v52 = vmul.f32 %v602_v59, %v1168_v50  ;;  %v606_v53 = vmul.f32 %v605_v60, %v1256_v43 }
  0x84   :  { %v607_v54 = vmul.f32 %v605_v60, %v1258_v44  ;;  %v610_v55 = vstv %s1296_s6  ;;  %v615_v6 = vstv %s1300_s7  ;;  %v620_v7 = vstv %s1304_s8 }
  0x85   :  { %v595_v33 = vmul.f32 %v593_v47, %v593_v47  ;;  %v596_v34 = vmul.f32 %v594_v48, %v594_v48  ;;  %v611_v56 = vmul.f32 %v610_v55, %v1256_v43  ;;  %v612_v57 = vmul.f32 %v610_v55, %v1258_v44 }
  0x86   :  { %v608_v58 = vadd.f32 %v606_v53, %v600_v40  ;;  %v609_v5 = vadd.f32 %v607_v54, %v601_v18  ;;  %v625_v12 = vstv %s1314_s9  ;;  %v628_v13 = vstv %s1318_s10 }
  0x87   :  { %v597_v49 = vadd.f32 %v595_v33, %v590_v45  ;;  %v598_v8 = vadd.f32 %v596_v34, %v591_v46  ;;  %v613_v50 = vadd.f32 %v611_v56, %v603_v51  ;;  %v614_v63 = vadd.f32 %v612_v57, %v604_v52 }
  0x89   :  { %v616_v3 = vmul.f32 %v615_v6, %v597_v49  ;;  %v617_v9 = vmul.f32 %v615_v6, %v598_v8  ;;  %v621_v10 = vmul.f32 %v620_v7, %v597_v49  ;;  %v622_v11 = vmul.f32 %v620_v7, %v598_v8 }
  0x8b   :  { %v618_v14 = vadd.f32 %v616_v3, %v608_v58  ;;  %v619_v15 = vadd.f32 %v617_v9, %v609_v5  ;;  %v623_v16 = vadd.f32 %v621_v10, %v613_v50  ;;  %v624_v43 = vadd.f32 %v622_v11, %v614_v63 }
  0x8d   :  { %v626_v19 = vadd.f32 %v625_v12, %v618_v14  ;;  %v627_v44 = vadd.f32 %v625_v12, %v619_v15  ;;  %v629_v35 = vadd.f32 %v628_v13, %v623_v16  ;;  %v630_v20 = vadd.f32 %v628_v13, %v624_v43 }
  0x8f   :  { %v631_v36 = vmul.f32 %v629_v35, %v629_v35  ;;  %v632_v21 = vmul.f32 %v630_v20, %v630_v20 }
  0x91   :  { %v633_v22 = vadd.f32 %v631_v36, %v626_v19  ;;  %v634_v23 = vadd.f32 %v632_v21, %v627_v44 }
  0x93   :  { %635 = vst [vmem:[%s1341_s2] sm:$0xff] %v633_v22 }
  0x94   :  { %636 = vst [vmem:[%s1341_s2 + $0x8] sm:$0xff] %v634_v23 }

</bundles_post_ra>
